<compile_context>
chip_gen: v5e
topology: v5e:2x2
jax: 0.10.0
libtpu: 0.0.40
codegen_flags: <defaults>
</compile_context>

<pallas_src>
import functools
import math

import jax
import jax.numpy as jnp
import numpy as np
from jax import lax
from jax.experimental import pallas as pl
from jax.experimental.pallas import tpu as pltpu

_EPS = 1e-5  # torch BatchNorm1d default eps
_HI = lax.Precision.HIGHEST  # wrapper-side weight-composition precision

_CPARAMS = pltpu.CompilerParams(dimension_semantics=("arbitrary",))


def _full_spec(shape):
    n = len(shape)
    return pl.BlockSpec(shape, lambda i, _n=n: (0,) * _n)


def _block_diag(mats):
    """Dense block-diagonal matrix from a list of (in, out) matrices."""
    rows = []
    for r, m in enumerate(mats):
        row = [m if c == r else jnp.zeros((m.shape[0], mats[c].shape[1]), m.dtype)
               for c in range(len(mats))]
        rows.append(jnp.concatenate(row, axis=1))
    return jnp.concatenate(rows, axis=0)


# --------------------------------------------------------------------------- #
# Fused kernel
# --------------------------------------------------------------------------- #
def _bn_relu(z, gamma, beta):
    # BatchNorm1d in training mode: batch statistics, biased variance.
    mean = jnp.mean(z, axis=0, keepdims=True)
    zc = z - mean                                   # centered once, reused
    var = jnp.mean(zc * zc, axis=0, keepdims=True)
    zn = zc * lax.rsqrt(var + _EPS) * gamma + beta
    return jnp.maximum(zn, 0.0)                     # ReLU


def _fused_kernel(*refs, treedef, n_in, t_limit, num_out_tasks):
    in_refs = refs[:n_in]
    out_ref = refs[n_in]
    p = jax.tree_util.tree_unflatten(treedef, in_refs)

    T = num_out_tasks
    xt = p["xt"][...]                                        # (B, D)

    # ---- time embedding (once, stays resident) ---------------------------- #
    args = p["t"][...] / t_limit * p["te_freq"][...] * (math.pi / 2.0)  # (B, E/2)
    emb = jnp.concatenate([jnp.sin(args), jnp.cos(args)], axis=1)       # (B, E)
    te = emb * jax.nn.sigmoid(emb)                                      # swish

    dot = lambda a, b: jnp.dot(a, b, preferred_element_type=jnp.float32)

    # ---- shared prefix: single (B, H) stream ------------------------------- #
    running = None
    for i, lp in enumerate(p["prefix"]):
        base = xt if i == 0 else running
        z = dot(base, lp["w"][...]) + dot(te, lp["tew"][...]) + lp["b"][...]
        act = _bn_relu(z, lp["gamma"][...], lp["beta"][...])
        running = act if i == 0 else running + act

    # ---- fork layer + packed suffix ---------------------------------------- #
    if "fork" in p:
        lp = p["fork"]
        base = xt if running is None else running            # still shared
        z = dot(base, lp["w"][...]) + dot(te, lp["tew"][...]) + lp["b"][...]
        act = _bn_relu(z, lp["gamma"][...], lp["beta"][...])  # (B, T*H)
        if running is None:
            running_p = act                                   # first layer: no residual
        else:
            running_p = jnp.concatenate([running] * T, axis=1) + act
        # remaining non-final layers operate on the packed (B, T*H) slab
        for lp2 in p["suffix"]:
            z = (dot(running_p, lp2["w"][...])                # block-diagonal weight
                 + dot(te, lp2["tew"][...]) + lp2["b"][...])
            act = _bn_relu(z, lp2["gamma"][...], lp2["beta"][...])
            running_p = running_p + act
        final_base = running_p                                # (B, T*H)
    else:
        final_base = xt if running is None else running       # (B, H) shared

    # ---- final layer (Linear + folded grouped-conv) ------------------------ #
    fp = p["final"]
    out_ref[...] = dot(final_base, fp["w"][...]) + fp["b"][...]   # (B, T*D) slab


# --------------------------------------------------------------------------- #
# Wrapper: fold/pack weights + single pallas_call
# --------------------------------------------------------------------------- #
def multitask_resnet_forward(params, xt, t, *, num_tasks, t_limit, shared_layers,
                             task_inds=None):
    out_tasks = list(range(num_tasks)) if task_inds is None else list(task_inds)
    T = len(out_tasks)
    B, D = xt.shape
    L = len(shared_layers)
    f32 = jnp.float32

    def compose(layer_p, te_p):
        # Fold the time-embedding Linear into the layer Linear (exact algebra).
        w = layer_p["w"].astype(f32)                                    # (in, out)
        tew = jnp.dot(te_p["w"].astype(f32), w, precision=_HI)          # (E, out)
        b = jnp.dot(te_p["b"].astype(f32), w, precision=_HI) + layer_p["b"].astype(f32)
        return w, tew, b

    # Fork index: first non-shared hidden layer (None -> all hidden shared).
    fork_idx = next((i for i in range(L - 1) if not shared_layers[i]), None)
    n_prefix = fork_idx if fork_idx is not None else (L - 1)

    prefix = []
    for i in range(n_prefix):
        lp = params["layers"][i][0]
        tp = params["time_embedders"][i][0]
        w, tew, b = compose(lp, tp)
        prefix.append({"w": w, "tew": tew, "b": b.reshape(1, -1),
                       "gamma": lp["gamma"].reshape(1, -1).astype(f32),
                       "beta": lp["beta"].reshape(1, -1).astype(f32)})

    kernel_inputs = {
        "xt": xt.astype(f32),
        "t": t.reshape(B, 1).astype(f32),
        "te_freq": params["te_rand_w"].reshape(1, -1).astype(f32),
        "prefix": prefix,
    }

    def packed_hidden(i, block_diag):
        ws, tews, bs, gs, bts = [], [], [], [], []
        for tk in out_tasks:
            c = 0 if shared_layers[i] else tk
            lp = params["layers"][i][c]
            tp = params["time_embedders"][i][c]
            w, tew, b = compose(lp, tp)
            ws.append(w); tews.append(tew); bs.append(b)
            gs.append(lp["gamma"].astype(f32)); bts.append(lp["beta"].astype(f32))
        return {
            "w": _block_diag(ws) if block_diag else jnp.concatenate(ws, axis=1),
            "tew": jnp.concatenate(tews, axis=1),
            "b": jnp.concatenate(bs).reshape(1, -1),
            "gamma": jnp.concatenate(gs).reshape(1, -1),
            "beta": jnp.concatenate(bts).reshape(1, -1),
        }

    if fork_idx is not None:
        # Fork layer: base is still shared -> dense lane-packed weight.
        kernel_inputs["fork"] = packed_hidden(fork_idx, block_diag=False)
        # Later hidden layers: per-task bases -> block-diagonal packed weight.
        kernel_inputs["suffix"] = [packed_hidden(i, block_diag=True)
                                   for i in range(fork_idx + 1, L - 1)]

    # Final layer: fold the grouped 1x1 conv (per-feature scale+bias) into it.
    fws, fbs = [], []
    for tk in out_tasks:
        c = 0 if shared_layers[L - 1] else tk
        lp = params["layers"][L - 1][c]
        cp = params["last_linears"][tk]
        cw = cp["w"].astype(f32)
        fws.append(lp["w"].astype(f32) * cw[None, :])
        fbs.append(lp["b"].astype(f32) * cw + cp["b"].astype(f32))
    fw = _block_diag(fws) if fork_idx is not None else jnp.concatenate(fws, axis=1)
    kernel_inputs["final"] = {"w": fw, "b": jnp.concatenate(fbs).reshape(1, -1)}

    flat, treedef = jax.tree_util.tree_flatten(kernel_inputs)
    n_in = len(flat)

    out = pl.pallas_call(
        functools.partial(_fused_kernel, treedef=treedef, n_in=n_in,
                          t_limit=float(t_limit), num_out_tasks=T),
        out_shape=jax.ShapeDtypeStruct((B, T * D), jnp.float32),
        grid=(1,),
        in_specs=[_full_spec(a.shape) for a in flat],
        out_specs=_full_spec((B, T * D)),
        compiler_params=_CPARAMS,
    )(*flat)
    return out.reshape(B, T, D)


# --------------------------------------------------------------------------- #
# Parameter init (deterministic, shapes mirror the torch __init__)
# --------------------------------------------------------------------------- #
def init_params(key, *, num_tasks, input_dim, hidden_dim, time_embed_size,
                time_embed_std, shared_layers):
    keys = iter(jax.random.split(key, 256))

    def linear(in_size, out_size):
        bound = 1.0 / math.sqrt(in_size)
        w = jax.random.uniform(next(keys), (in_size, out_size), jnp.float32,
                               -bound, bound)  # stored as (in, out) == W.T
        b = jax.random.uniform(next(keys), (out_size,), jnp.float32, -bound, bound)
        return w, b

    params = {
        "te_rand_w": jax.random.normal(next(keys), (time_embed_size // 2,),
                                       jnp.float32) * time_embed_std
    }
    L = len(shared_layers)
    layers, time_embedders = [], []
    for i in range(L):
        if i == 0:
            in_size, out_size = input_dim, hidden_dim
        elif i < L - 1:
            in_size, out_size = hidden_dim, hidden_dim
        else:
            in_size, out_size = hidden_dim, input_dim
        n_copies = 1 if shared_layers[i] else num_tasks
        copies = []
        for _ in range(n_copies):
            w, b = linear(in_size, out_size)
            p = {"w": w, "b": b}
            if i < L - 1:  # BN only on non-final layers (torch default init)
                p["gamma"] = jnp.ones((out_size,), jnp.float32)
                p["beta"] = jnp.zeros((out_size,), jnp.float32)
            copies.append(p)
        layers.append(copies)
        if i < L - 1:
            te_copies = []
            for _ in range(n_copies):
                w, b = linear(time_embed_size, in_size)
                te_copies.append({"w": w, "b": b})
            time_embedders.append(te_copies)
    params["layers"] = layers
    params["time_embedders"] = time_embedders

    convs = []
    for _ in range(num_tasks):  # Conv1d(D, D, 1, groups=D): weight (D,1,1), bias (D,)
        cw = jax.random.uniform(next(keys), (input_dim,), jnp.float32, -1.0, 1.0)
        cb = jax.random.uniform(next(keys), (input_dim,), jnp.float32, -1.0, 1.0)
        convs.append({"w": cw, "b": cb})
    params["last_linears"] = convs
    return params


# --------------------------------------------------------------------------- #
# Pure-numpy reference (float64, unpacked/unfolded weights) for validation
# --------------------------------------------------------------------------- #
def reference_forward(params, xt, t, *, num_tasks, t_limit, shared_layers):
    f64 = lambda a: np.asarray(a, dtype=np.float64)
    xt = f64(xt)
    t = f64(t)
    args = t[:, None] / t_limit * f64(params["te_rand_w"])[None, :] * (np.pi / 2)
    emb = np.concatenate([np.sin(args), np.cos(args)], axis=1)
    emb = emb * (1.0 / (1.0 + np.exp(-emb)))  # swish
    L = len(shared_layers)

    def bn_relu(z, gamma, beta):
        mean = z.mean(axis=0, keepdims=True)
        var = ((z - mean) ** 2).mean(axis=0, keepdims=True)
        zn = (z - mean) / np.sqrt(var + _EPS) * f64(gamma)[None, :] + f64(beta)[None, :]
        return np.maximum(zn, 0.0)

    running = [None] * num_tasks
    outs = [None] * num_tasks
    for i in range(L):
        for o in range(num_tasks):
            l = 0 if shared_layers[i] else o
            lp = params["layers"][i][l]
            if i < L - 1:
                tp = params["time_embedders"][i][l]
                te_proj = emb @ f64(tp["w"]) + f64(tp["b"])[None, :]
            if i == 0:
                h = xt + te_proj
                running[o] = bn_relu(h @ f64(lp["w"]) + f64(lp["b"])[None, :],
                                     lp["gamma"], lp["beta"])
            elif i < L - 1:
                h = running[o] + te_proj
                running[o] = running[o] + bn_relu(
                    h @ f64(lp["w"]) + f64(lp["b"])[None, :], lp["gamma"], lp["beta"])
            else:
                z = running[o] @ f64(lp["w"]) + f64(lp["b"])[None, :]
                cp = params["last_linears"][o]
                outs[o] = z * f64(cp["w"])[None, :] + f64(cp["b"])[None, :]
    return np.stack(outs, axis=1)


if __name__ == "__main__":
    # small, module-consistent shapes
    num_tasks = 3
    input_dim = 16
    hidden_dim = 32
    time_embed_size = 32
    time_embed_std = 30
    t_limit = 1.0
    shared_layers = [True, True, True, False, False]
    B = 8

    key = jax.random.PRNGKey(0)
    pkey, xkey, tkey = jax.random.split(key, 3)
    params = init_params(pkey, num_tasks=num_tasks, input_dim=input_dim,
                         hidden_dim=hidden_dim, time_embed_size=time_embed_size,
                         time_embed_std=time_embed_std, shared_layers=shared_layers)
    xt = jax.random.normal(xkey, (B, input_dim), jnp.float32)
    t = jax.random.uniform(tkey, (B,), jnp.float32)

    out = multitask_resnet_forward(params, xt, t, num_tasks=num_tasks,
                                   t_limit=t_limit, shared_layers=shared_layers)
    out = jax.block_until_ready(out)
    assert out.shape == (B, num_tasks, input_dim), out.shape

    ref = reference_forward(params, xt, t, num_tasks=num_tasks, t_limit=t_limit,
                            shared_layers=shared_layers)
    np.testing.assert_allclose(np.asarray(out, dtype=np.float64), ref,
                               rtol=1e-4, atol=1e-4)
    print("KERNEL_OK")
</pallas_src>

<mosaic_0001>
module attributes {stable_mosaic.version = 11 : i64} {
  func.func @_fused_kernel(%arg0: i32, %arg1: memref<1x48xf32, #tpu.memory_space<vmem>>, %arg2: memref<96x48xf32, #tpu.memory_space<vmem>>, %arg3: memref<1x96xf32, #tpu.memory_space<vmem>>, %arg4: memref<1x96xf32, #tpu.memory_space<vmem>>, %arg5: memref<1x96xf32, #tpu.memory_space<vmem>>, %arg6: memref<32x96xf32, #tpu.memory_space<vmem>>, %arg7: memref<32x96xf32, #tpu.memory_space<vmem>>, %arg8: memref<1x32xf32, #tpu.memory_space<vmem>>, %arg9: memref<1x32xf32, #tpu.memory_space<vmem>>, %arg10: memref<1x32xf32, #tpu.memory_space<vmem>>, %arg11: memref<32x32xf32, #tpu.memory_space<vmem>>, %arg12: memref<16x32xf32, #tpu.memory_space<vmem>>, %arg13: memref<1x32xf32, #tpu.memory_space<vmem>>, %arg14: memref<1x32xf32, #tpu.memory_space<vmem>>, %arg15: memref<1x32xf32, #tpu.memory_space<vmem>>, %arg16: memref<32x32xf32, #tpu.memory_space<vmem>>, %arg17: memref<32x32xf32, #tpu.memory_space<vmem>>, %arg18: memref<1x32xf32, #tpu.memory_space<vmem>>, %arg19: memref<1x32xf32, #tpu.memory_space<vmem>>, %arg20: memref<1x32xf32, #tpu.memory_space<vmem>>, %arg21: memref<32x32xf32, #tpu.memory_space<vmem>>, %arg22: memref<32x32xf32, #tpu.memory_space<vmem>>, %arg23: memref<8x1xf32, #tpu.memory_space<vmem>>, %arg24: memref<1x16xf32, #tpu.memory_space<vmem>>, %arg25: memref<8x16xf32, #tpu.memory_space<vmem>>, %arg26: memref<8x48xf32, #tpu.memory_space<vmem>>) attributes {dimension_semantics = [#tpu.dimension_semantics<arbitrary>], iteration_bounds = array<i64: 1>, scalar_prefetch = 0 : i64, scratch_operands = 0 : i64, tpu.core_type = #tpu.core_type<tc>, window_params = [{pipeline_mode = #tpu.pipeline_mode<synchronous>, transform_indices = @transform_0, window_bounds = array<i64: 1, 48>}, {pipeline_mode = #tpu.pipeline_mode<synchronous>, transform_indices = @transform_1, window_bounds = array<i64: 96, 48>}, {pipeline_mode = #tpu.pipeline_mode<synchronous>, transform_indices = @transform_2, window_bounds = array<i64: 1, 96>}, {pipeline_mode = #tpu.pipeline_mode<synchronous>, transform_indices = @transform_3, window_bounds = array<i64: 1, 96>}, {pipeline_mode = #tpu.pipeline_mode<synchronous>, transform_indices = @transform_4, window_bounds = array<i64: 1, 96>}, {pipeline_mode = #tpu.pipeline_mode<synchronous>, transform_indices = @transform_5, window_bounds = array<i64: 32, 96>}, {pipeline_mode = #tpu.pipeline_mode<synchronous>, transform_indices = @transform_6, window_bounds = array<i64: 32, 96>}, {pipeline_mode = #tpu.pipeline_mode<synchronous>, transform_indices = @transform_7, window_bounds = array<i64: 1, 32>}, {pipeline_mode = #tpu.pipeline_mode<synchronous>, transform_indices = @transform_8, window_bounds = array<i64: 1, 32>}, {pipeline_mode = #tpu.pipeline_mode<synchronous>, transform_indices = @transform_9, window_bounds = array<i64: 1, 32>}, {pipeline_mode = #tpu.pipeline_mode<synchronous>, transform_indices = @transform_10, window_bounds = array<i64: 32, 32>}, {pipeline_mode = #tpu.pipeline_mode<synchronous>, transform_indices = @transform_11, window_bounds = array<i64: 16, 32>}, {pipeline_mode = #tpu.pipeline_mode<synchronous>, transform_indices = @transform_12, window_bounds = array<i64: 1, 32>}, {pipeline_mode = #tpu.pipeline_mode<synchronous>, transform_indices = @transform_13, window_bounds = array<i64: 1, 32>}, {pipeline_mode = #tpu.pipeline_mode<synchronous>, transform_indices = @transform_14, window_bounds = array<i64: 1, 32>}, {pipeline_mode = #tpu.pipeline_mode<synchronous>, transform_indices = @transform_15, window_bounds = array<i64: 32, 32>}, {pipeline_mode = #tpu.pipeline_mode<synchronous>, transform_indices = @transform_16, window_bounds = array<i64: 32, 32>}, {pipeline_mode = #tpu.pipeline_mode<synchronous>, transform_indices = @transform_17, window_bounds = array<i64: 1, 32>}, {pipeline_mode = #tpu.pipeline_mode<synchronous>, transform_indices = @transform_18, window_bounds = array<i64: 1, 32>}, {pipeline_mode = #tpu.pipeline_mode<synchronous>, transform_indices = @transform_19, window_bounds = array<i64: 1, 32>}, {pipeline_mode = #tpu.pipeline_mode<synchronous>, transform_indices = @transform_20, window_bounds = array<i64: 32, 32>}, {pipeline_mode = #tpu.pipeline_mode<synchronous>, transform_indices = @transform_21, window_bounds = array<i64: 32, 32>}, {pipeline_mode = #tpu.pipeline_mode<synchronous>, transform_indices = @transform_22, window_bounds = array<i64: 8, 1>}, {pipeline_mode = #tpu.pipeline_mode<synchronous>, transform_indices = @transform_23, window_bounds = array<i64: 1, 16>}, {pipeline_mode = #tpu.pipeline_mode<synchronous>, transform_indices = @transform_24, window_bounds = array<i64: 8, 16>}, {pipeline_mode = #tpu.pipeline_mode<synchronous>, transform_indices = @transform_25, window_bounds = array<i64: 8, 48>}]} {
    %c0 = arith.constant 0 : index
    %c0_0 = arith.constant 0 : index
    %0 = vector.load %arg25[%c0, %c0_0] : memref<8x16xf32, #tpu.memory_space<vmem>>, vector<8x16xf32>
    %c0_1 = arith.constant 0 : index
    %c0_2 = arith.constant 0 : index
    %1 = vector.load %arg23[%c0_1, %c0_2] : memref<8x1xf32, #tpu.memory_space<vmem>>, vector<8x1xf32>
    %cst = arith.constant 1.000000e+00 : f32
    %2 = vector.broadcast %cst : f32 to vector<8x1xf32>
    %3 = arith.divf %1, %2 : vector<8x1xf32>
    %c0_3 = arith.constant 0 : index
    %c0_4 = arith.constant 0 : index
    %4 = vector.load %arg24[%c0_3, %c0_4] : memref<1x16xf32, #tpu.memory_space<vmem>>, vector<1x16xf32>
    %5 = vector.broadcast %3 : vector<8x1xf32> to vector<8x16xf32>
    %6 = vector.broadcast %4 : vector<1x16xf32> to vector<8x16xf32>
    %7 = arith.mulf %5, %6 : vector<8x16xf32>
    %cst_5 = arith.constant 1.57079637 : f32
    %8 = vector.broadcast %cst_5 : f32 to vector<8x16xf32>
    %9 = arith.mulf %7, %8 : vector<8x16xf32>
    %10 = math.sin %9 : vector<8x16xf32>
    %11 = math.cos %9 : vector<8x16xf32>
    %12 = tpu.concatenate %10, %11 in 1 : vector<8x16xf32>, vector<8x16xf32> -> vector<8x32xf32>
    %13 = arith.negf %12 : vector<8x32xf32>
    %14 = math.exp %13 : vector<8x32xf32>
    %cst_6 = arith.constant 1.000000e+00 : f32
    %15 = vector.broadcast %cst_6 : f32 to vector<8x32xf32>
    %16 = arith.addf %15, %14 : vector<8x32xf32>
    %17 = arith.divf %15, %16 : vector<8x32xf32>
    %18 = arith.mulf %12, %17 : vector<8x32xf32>
    %c0_7 = arith.constant 0 : index
    %c0_8 = arith.constant 0 : index
    %19 = vector.load %arg12[%c0_7, %c0_8] : memref<16x32xf32, #tpu.memory_space<vmem>>, vector<16x32xf32>
    %cst_9 = arith.constant dense<0.000000e+00> : vector<8x32xf32>
    %20 = tpu.matmul %0, %19, %cst_9 {dimension_numbers = #tpu.dot_dimension_numbers<[1], [0], [0], [1], [0, 0, 1, 1], [], []>} : vector<8x16xf32>, vector<16x32xf32>, vector<8x32xf32> -> vector<8x32xf32>
    %c0_10 = arith.constant 0 : index
    %c0_11 = arith.constant 0 : index
    %21 = vector.load %arg11[%c0_10, %c0_11] : memref<32x32xf32, #tpu.memory_space<vmem>>, vector<32x32xf32>
    %cst_12 = arith.constant dense<0.000000e+00> : vector<8x32xf32>
    %22 = tpu.matmul %18, %21, %cst_12 {dimension_numbers = #tpu.dot_dimension_numbers<[1], [0], [0], [1], [0, 0, 1, 1], [], []>} : vector<8x32xf32>, vector<32x32xf32>, vector<8x32xf32> -> vector<8x32xf32>
    %23 = arith.addf %20, %22 : vector<8x32xf32>
    %c0_13 = arith.constant 0 : index
    %c0_14 = arith.constant 0 : index
    %24 = vector.load %arg8[%c0_13, %c0_14] : memref<1x32xf32, #tpu.memory_space<vmem>>, vector<1x32xf32>
    %25 = vector.broadcast %24 : vector<1x32xf32> to vector<8x32xf32>
    %26 = arith.addf %23, %25 : vector<8x32xf32>
    %c0_15 = arith.constant 0 : index
    %c0_16 = arith.constant 0 : index
    %27 = vector.load %arg10[%c0_15, %c0_16] : memref<1x32xf32, #tpu.memory_space<vmem>>, vector<1x32xf32>
    %c0_17 = arith.constant 0 : index
    %c0_18 = arith.constant 0 : index
    %28 = vector.load %arg9[%c0_17, %c0_18] : memref<1x32xf32, #tpu.memory_space<vmem>>, vector<1x32xf32>
    %cst_19 = arith.constant dense<0.000000e+00> : vector<32xf32>
    %29 = vector.multi_reduction <add>, %26, %cst_19 [0] : vector<8x32xf32> to vector<32xf32>
    %30 = vector.shape_cast %29 : vector<32xf32> to vector<1x32xf32>
    %cst_20 = arith.constant 8.000000e+00 : f32
    %31 = vector.broadcast %cst_20 : f32 to vector<1x32xf32>
    %32 = arith.divf %30, %31 : vector<1x32xf32>
    %33 = vector.broadcast %32 : vector<1x32xf32> to vector<8x32xf32>
    %34 = arith.subf %26, %33 : vector<8x32xf32>
    %35 = arith.mulf %34, %34 : vector<8x32xf32>
    %cst_21 = arith.constant dense<0.000000e+00> : vector<32xf32>
    %36 = vector.multi_reduction <add>, %35, %cst_21 [0] : vector<8x32xf32> to vector<32xf32>
    %37 = vector.shape_cast %36 : vector<32xf32> to vector<1x32xf32>
    %cst_22 = arith.constant 8.000000e+00 : f32
    %38 = vector.broadcast %cst_22 : f32 to vector<1x32xf32>
    %39 = arith.divf %37, %38 : vector<1x32xf32>
    %cst_23 = arith.constant 9.99999974E-6 : f32
    %40 = vector.broadcast %cst_23 : f32 to vector<1x32xf32>
    %41 = arith.addf %39, %40 : vector<1x32xf32>
    %42 = math.rsqrt %41 : vector<1x32xf32>
    %43 = vector.broadcast %42 : vector<1x32xf32> to vector<8x32xf32>
    %44 = arith.mulf %34, %43 : vector<8x32xf32>
    %45 = vector.broadcast %27 : vector<1x32xf32> to vector<8x32xf32>
    %46 = arith.mulf %44, %45 : vector<8x32xf32>
    %47 = vector.broadcast %28 : vector<1x32xf32> to vector<8x32xf32>
    %48 = arith.addf %46, %47 : vector<8x32xf32>
    %cst_24 = arith.constant 0.000000e+00 : f32
    %49 = vector.broadcast %cst_24 : f32 to vector<8x32xf32>
    %50 = arith.maximumf %48, %49 : vector<8x32xf32>
    %c0_25 = arith.constant 0 : index
    %c0_26 = arith.constant 0 : index
    %51 = vector.load %arg17[%c0_25, %c0_26] : memref<32x32xf32, #tpu.memory_space<vmem>>, vector<32x32xf32>
    %cst_27 = arith.constant dense<0.000000e+00> : vector<8x32xf32>
    %52 = tpu.matmul %50, %51, %cst_27 {dimension_numbers = #tpu.dot_dimension_numbers<[1], [0], [0], [1], [0, 0, 1, 1], [], []>} : vector<8x32xf32>, vector<32x32xf32>, vector<8x32xf32> -> vector<8x32xf32>
    %c0_28 = arith.constant 0 : index
    %c0_29 = arith.constant 0 : index
    %53 = vector.load %arg16[%c0_28, %c0_29] : memref<32x32xf32, #tpu.memory_space<vmem>>, vector<32x32xf32>
    %cst_30 = arith.constant dense<0.000000e+00> : vector<8x32xf32>
    %54 = tpu.matmul %18, %53, %cst_30 {dimension_numbers = #tpu.dot_dimension_numbers<[1], [0], [0], [1], [0, 0, 1, 1], [], []>} : vector<8x32xf32>, vector<32x32xf32>, vector<8x32xf32> -> vector<8x32xf32>
    %55 = arith.addf %52, %54 : vector<8x32xf32>
    %c0_31 = arith.constant 0 : index
    %c0_32 = arith.constant 0 : index
    %56 = vector.load %arg13[%c0_31, %c0_32] : memref<1x32xf32, #tpu.memory_space<vmem>>, vector<1x32xf32>
    %57 = vector.broadcast %56 : vector<1x32xf32> to vector<8x32xf32>
    %58 = arith.addf %55, %57 : vector<8x32xf32>
    %c0_33 = arith.constant 0 : index
    %c0_34 = arith.constant 0 : index
    %59 = vector.load %arg15[%c0_33, %c0_34] : memref<1x32xf32, #tpu.memory_space<vmem>>, vector<1x32xf32>
    %c0_35 = arith.constant 0 : index
    %c0_36 = arith.constant 0 : index
    %60 = vector.load %arg14[%c0_35, %c0_36] : memref<1x32xf32, #tpu.memory_space<vmem>>, vector<1x32xf32>
    %cst_37 = arith.constant dense<0.000000e+00> : vector<32xf32>
    %61 = vector.multi_reduction <add>, %58, %cst_37 [0] : vector<8x32xf32> to vector<32xf32>
    %62 = vector.shape_cast %61 : vector<32xf32> to vector<1x32xf32>
    %cst_38 = arith.constant 8.000000e+00 : f32
    %63 = vector.broadcast %cst_38 : f32 to vector<1x32xf32>
    %64 = arith.divf %62, %63 : vector<1x32xf32>
    %65 = vector.broadcast %64 : vector<1x32xf32> to vector<8x32xf32>
    %66 = arith.subf %58, %65 : vector<8x32xf32>
    %67 = arith.mulf %66, %66 : vector<8x32xf32>
    %cst_39 = arith.constant dense<0.000000e+00> : vector<32xf32>
    %68 = vector.multi_reduction <add>, %67, %cst_39 [0] : vector<8x32xf32> to vector<32xf32>
    %69 = vector.shape_cast %68 : vector<32xf32> to vector<1x32xf32>
    %cst_40 = arith.constant 8.000000e+00 : f32
    %70 = vector.broadcast %cst_40 : f32 to vector<1x32xf32>
    %71 = arith.divf %69, %70 : vector<1x32xf32>
    %cst_41 = arith.constant 9.99999974E-6 : f32
    %72 = vector.broadcast %cst_41 : f32 to vector<1x32xf32>
    %73 = arith.addf %71, %72 : vector<1x32xf32>
    %74 = math.rsqrt %73 : vector<1x32xf32>
    %75 = vector.broadcast %74 : vector<1x32xf32> to vector<8x32xf32>
    %76 = arith.mulf %66, %75 : vector<8x32xf32>
    %77 = vector.broadcast %59 : vector<1x32xf32> to vector<8x32xf32>
    %78 = arith.mulf %76, %77 : vector<8x32xf32>
    %79 = vector.broadcast %60 : vector<1x32xf32> to vector<8x32xf32>
    %80 = arith.addf %78, %79 : vector<8x32xf32>
    %cst_42 = arith.constant 0.000000e+00 : f32
    %81 = vector.broadcast %cst_42 : f32 to vector<8x32xf32>
    %82 = arith.maximumf %80, %81 : vector<8x32xf32>
    %83 = arith.addf %50, %82 : vector<8x32xf32>
    %c0_43 = arith.constant 0 : index
    %c0_44 = arith.constant 0 : index
    %84 = vector.load %arg22[%c0_43, %c0_44] : memref<32x32xf32, #tpu.memory_space<vmem>>, vector<32x32xf32>
    %cst_45 = arith.constant dense<0.000000e+00> : vector<8x32xf32>
    %85 = tpu.matmul %83, %84, %cst_45 {dimension_numbers = #tpu.dot_dimension_numbers<[1], [0], [0], [1], [0, 0, 1, 1], [], []>} : vector<8x32xf32>, vector<32x32xf32>, vector<8x32xf32> -> vector<8x32xf32>
    %c0_46 = arith.constant 0 : index
    %c0_47 = arith.constant 0 : index
    %86 = vector.load %arg21[%c0_46, %c0_47] : memref<32x32xf32, #tpu.memory_space<vmem>>, vector<32x32xf32>
    %cst_48 = arith.constant dense<0.000000e+00> : vector<8x32xf32>
    %87 = tpu.matmul %18, %86, %cst_48 {dimension_numbers = #tpu.dot_dimension_numbers<[1], [0], [0], [1], [0, 0, 1, 1], [], []>} : vector<8x32xf32>, vector<32x32xf32>, vector<8x32xf32> -> vector<8x32xf32>
    %88 = arith.addf %85, %87 : vector<8x32xf32>
    %c0_49 = arith.constant 0 : index
    %c0_50 = arith.constant 0 : index
    %89 = vector.load %arg18[%c0_49, %c0_50] : memref<1x32xf32, #tpu.memory_space<vmem>>, vector<1x32xf32>
    %90 = vector.broadcast %89 : vector<1x32xf32> to vector<8x32xf32>
    %91 = arith.addf %88, %90 : vector<8x32xf32>
    %c0_51 = arith.constant 0 : index
    %c0_52 = arith.constant 0 : index
    %92 = vector.load %arg20[%c0_51, %c0_52] : memref<1x32xf32, #tpu.memory_space<vmem>>, vector<1x32xf32>
    %c0_53 = arith.constant 0 : index
    %c0_54 = arith.constant 0 : index
    %93 = vector.load %arg19[%c0_53, %c0_54] : memref<1x32xf32, #tpu.memory_space<vmem>>, vector<1x32xf32>
    %cst_55 = arith.constant dense<0.000000e+00> : vector<32xf32>
    %94 = vector.multi_reduction <add>, %91, %cst_55 [0] : vector<8x32xf32> to vector<32xf32>
    %95 = vector.shape_cast %94 : vector<32xf32> to vector<1x32xf32>
    %cst_56 = arith.constant 8.000000e+00 : f32
    %96 = vector.broadcast %cst_56 : f32 to vector<1x32xf32>
    %97 = arith.divf %95, %96 : vector<1x32xf32>
    %98 = vector.broadcast %97 : vector<1x32xf32> to vector<8x32xf32>
    %99 = arith.subf %91, %98 : vector<8x32xf32>
    %100 = arith.mulf %99, %99 : vector<8x32xf32>
    %cst_57 = arith.constant dense<0.000000e+00> : vector<32xf32>
    %101 = vector.multi_reduction <add>, %100, %cst_57 [0] : vector<8x32xf32> to vector<32xf32>
    %102 = vector.shape_cast %101 : vector<32xf32> to vector<1x32xf32>
    %cst_58 = arith.constant 8.000000e+00 : f32
    %103 = vector.broadcast %cst_58 : f32 to vector<1x32xf32>
    %104 = arith.divf %102, %103 : vector<1x32xf32>
    %cst_59 = arith.constant 9.99999974E-6 : f32
    %105 = vector.broadcast %cst_59 : f32 to vector<1x32xf32>
    %106 = arith.addf %104, %105 : vector<1x32xf32>
    %107 = math.rsqrt %106 : vector<1x32xf32>
    %108 = vector.broadcast %107 : vector<1x32xf32> to vector<8x32xf32>
    %109 = arith.mulf %99, %108 : vector<8x32xf32>
    %110 = vector.broadcast %92 : vector<1x32xf32> to vector<8x32xf32>
    %111 = arith.mulf %109, %110 : vector<8x32xf32>
    %112 = vector.broadcast %93 : vector<1x32xf32> to vector<8x32xf32>
    %113 = arith.addf %111, %112 : vector<8x32xf32>
    %cst_60 = arith.constant 0.000000e+00 : f32
    %114 = vector.broadcast %cst_60 : f32 to vector<8x32xf32>
    %115 = arith.maximumf %113, %114 : vector<8x32xf32>
    %116 = arith.addf %83, %115 : vector<8x32xf32>
    %c0_61 = arith.constant 0 : index
    %c0_62 = arith.constant 0 : index
    %117 = vector.load %arg7[%c0_61, %c0_62] : memref<32x96xf32, #tpu.memory_space<vmem>>, vector<32x96xf32>
    %cst_63 = arith.constant dense<0.000000e+00> : vector<8x96xf32>
    %118 = tpu.matmul %116, %117, %cst_63 {dimension_numbers = #tpu.dot_dimension_numbers<[1], [0], [0], [1], [0, 0, 1, 1], [], []>} : vector<8x32xf32>, vector<32x96xf32>, vector<8x96xf32> -> vector<8x96xf32>
    %c0_64 = arith.constant 0 : index
    %c0_65 = arith.constant 0 : index
    %119 = vector.load %arg6[%c0_64, %c0_65] : memref<32x96xf32, #tpu.memory_space<vmem>>, vector<32x96xf32>
    %cst_66 = arith.constant dense<0.000000e+00> : vector<8x96xf32>
    %120 = tpu.matmul %18, %119, %cst_66 {dimension_numbers = #tpu.dot_dimension_numbers<[1], [0], [0], [1], [0, 0, 1, 1], [], []>} : vector<8x32xf32>, vector<32x96xf32>, vector<8x96xf32> -> vector<8x96xf32>
    %121 = arith.addf %118, %120 : vector<8x96xf32>
    %c0_67 = arith.constant 0 : index
    %c0_68 = arith.constant 0 : index
    %122 = vector.load %arg3[%c0_67, %c0_68] : memref<1x96xf32, #tpu.memory_space<vmem>>, vector<1x96xf32>
    %123 = vector.broadcast %122 : vector<1x96xf32> to vector<8x96xf32>
    %124 = arith.addf %121, %123 : vector<8x96xf32>
    %c0_69 = arith.constant 0 : index
    %c0_70 = arith.constant 0 : index
    %125 = vector.load %arg5[%c0_69, %c0_70] : memref<1x96xf32, #tpu.memory_space<vmem>>, vector<1x96xf32>
    %c0_71 = arith.constant 0 : index
    %c0_72 = arith.constant 0 : index
    %126 = vector.load %arg4[%c0_71, %c0_72] : memref<1x96xf32, #tpu.memory_space<vmem>>, vector<1x96xf32>
    %cst_73 = arith.constant dense<0.000000e+00> : vector<96xf32>
    %127 = vector.multi_reduction <add>, %124, %cst_73 [0] : vector<8x96xf32> to vector<96xf32>
    %128 = vector.shape_cast %127 : vector<96xf32> to vector<1x96xf32>
    %cst_74 = arith.constant 8.000000e+00 : f32
    %129 = vector.broadcast %cst_74 : f32 to vector<1x96xf32>
    %130 = arith.divf %128, %129 : vector<1x96xf32>
    %131 = vector.broadcast %130 : vector<1x96xf32> to vector<8x96xf32>
    %132 = arith.subf %124, %131 : vector<8x96xf32>
    %133 = arith.mulf %132, %132 : vector<8x96xf32>
    %cst_75 = arith.constant dense<0.000000e+00> : vector<96xf32>
    %134 = vector.multi_reduction <add>, %133, %cst_75 [0] : vector<8x96xf32> to vector<96xf32>
    %135 = vector.shape_cast %134 : vector<96xf32> to vector<1x96xf32>
    %cst_76 = arith.constant 8.000000e+00 : f32
    %136 = vector.broadcast %cst_76 : f32 to vector<1x96xf32>
    %137 = arith.divf %135, %136 : vector<1x96xf32>
    %cst_77 = arith.constant 9.99999974E-6 : f32
    %138 = vector.broadcast %cst_77 : f32 to vector<1x96xf32>
    %139 = arith.addf %137, %138 : vector<1x96xf32>
    %140 = math.rsqrt %139 : vector<1x96xf32>
    %141 = vector.broadcast %140 : vector<1x96xf32> to vector<8x96xf32>
    %142 = arith.mulf %132, %141 : vector<8x96xf32>
    %143 = vector.broadcast %125 : vector<1x96xf32> to vector<8x96xf32>
    %144 = arith.mulf %142, %143 : vector<8x96xf32>
    %145 = vector.broadcast %126 : vector<1x96xf32> to vector<8x96xf32>
    %146 = arith.addf %144, %145 : vector<8x96xf32>
    %cst_78 = arith.constant 0.000000e+00 : f32
    %147 = vector.broadcast %cst_78 : f32 to vector<8x96xf32>
    %148 = arith.maximumf %146, %147 : vector<8x96xf32>
    %149 = tpu.concatenate %116, %116, %116 in 1 : vector<8x32xf32>, vector<8x32xf32>, vector<8x32xf32> -> vector<8x96xf32>
    %150 = arith.addf %149, %148 : vector<8x96xf32>
    %c0_79 = arith.constant 0 : index
    %c0_80 = arith.constant 0 : index
    %151 = vector.load %arg2[%c0_79, %c0_80] : memref<96x48xf32, #tpu.memory_space<vmem>>, vector<96x48xf32>
    %cst_81 = arith.constant dense<0.000000e+00> : vector<8x48xf32>
    %152 = tpu.matmul %150, %151, %cst_81 {dimension_numbers = #tpu.dot_dimension_numbers<[1], [0], [0], [1], [0, 0, 1, 1], [], []>} : vector<8x96xf32>, vector<96x48xf32>, vector<8x48xf32> -> vector<8x48xf32>
    %c0_82 = arith.constant 0 : index
    %c0_83 = arith.constant 0 : index
    %153 = vector.load %arg1[%c0_82, %c0_83] : memref<1x48xf32, #tpu.memory_space<vmem>>, vector<1x48xf32>
    %154 = vector.broadcast %153 : vector<1x48xf32> to vector<8x48xf32>
    %155 = arith.addf %152, %154 : vector<8x48xf32>
    %c0_84 = arith.constant 0 : index
    %c0_85 = arith.constant 0 : index
    %156 = vector.load %arg26[%c0_84, %c0_85] : memref<8x48xf32, #tpu.memory_space<vmem>>, vector<8x48xf32>
    tpu.vector_store %arg26[%c0_84, %c0_85], %155 {strides = array<i32>} : memref<8x48xf32, #tpu.memory_space<vmem>>, vector<8x48xf32>,
    return
  }
  func.func @transform_0(%arg0: i32) -> (i32, i32) {
    %c0_i32 = arith.constant 0 : i32
    %c0_i32_0 = arith.constant 0 : i32
    %c0_i32_1 = arith.constant 0 : i32
    return %c0_i32, %c0_i32_0 : i32, i32
  }
  func.func @transform_1(%arg0: i32) -> (i32, i32) {
    %c0_i32 = arith.constant 0 : i32
    %c0_i32_0 = arith.constant 0 : i32
    %c0_i32_1 = arith.constant 0 : i32
    return %c0_i32, %c0_i32_0 : i32, i32
  }
  func.func @transform_2(%arg0: i32) -> (i32, i32) {
    %c0_i32 = arith.constant 0 : i32
    %c0_i32_0 = arith.constant 0 : i32
    %c0_i32_1 = arith.constant 0 : i32
    return %c0_i32, %c0_i32_0 : i32, i32
  }
  func.func @transform_3(%arg0: i32) -> (i32, i32) {
    %c0_i32 = arith.constant 0 : i32
    %c0_i32_0 = arith.constant 0 : i32
    %c0_i32_1 = arith.constant 0 : i32
    return %c0_i32, %c0_i32_0 : i32, i32
  }
  func.func @transform_4(%arg0: i32) -> (i32, i32) {
    %c0_i32 = arith.constant 0 : i32
    %c0_i32_0 = arith.constant 0 : i32
    %c0_i32_1 = arith.constant 0 : i32
    return %c0_i32, %c0_i32_0 : i32, i32
  }
  func.func @transform_5(%arg0: i32) -> (i32, i32) {
    %c0_i32 = arith.constant 0 : i32
    %c0_i32_0 = arith.constant 0 : i32
    %c0_i32_1 = arith.constant 0 : i32
    return %c0_i32, %c0_i32_0 : i32, i32
  }
  func.func @transform_6(%arg0: i32) -> (i32, i32) {
    %c0_i32 = arith.constant 0 : i32
    %c0_i32_0 = arith.constant 0 : i32
    %c0_i32_1 = arith.constant 0 : i32
    return %c0_i32, %c0_i32_0 : i32, i32
  }
  func.func @transform_7(%arg0: i32) -> (i32, i32) {
    %c0_i32 = arith.constant 0 : i32
    %c0_i32_0 = arith.constant 0 : i32
    %c0_i32_1 = arith.constant 0 : i32
    return %c0_i32, %c0_i32_0 : i32, i32
  }
  func.func @transform_8(%arg0: i32) -> (i32, i32) {
    %c0_i32 = arith.constant 0 : i32
    %c0_i32_0 = arith.constant 0 : i32
    %c0_i32_1 = arith.constant 0 : i32
    return %c0_i32, %c0_i32_0 : i32, i32
  }
  func.func @transform_9(%arg0: i32) -> (i32, i32) {
    %c0_i32 = arith.constant 0 : i32
    %c0_i32_0 = arith.constant 0 : i32
    %c0_i32_1 = arith.constant 0 : i32
    return %c0_i32, %c0_i32_0 : i32, i32
  }
  func.func @transform_10(%arg0: i32) -> (i32, i32) {
    %c0_i32 = arith.constant 0 : i32
    %c0_i32_0 = arith.constant 0 : i32
    %c0_i32_1 = arith.constant 0 : i32
    return %c0_i32, %c0_i32_0 : i32, i32
  }
  func.func @transform_11(%arg0: i32) -> (i32, i32) {
    %c0_i32 = arith.constant 0 : i32
    %c0_i32_0 = arith.constant 0 : i32
    %c0_i32_1 = arith.constant 0 : i32
    return %c0_i32, %c0_i32_0 : i32, i32
  }
  func.func @transform_12(%arg0: i32) -> (i32, i32) {
    %c0_i32 = arith.constant 0 : i32
    %c0_i32_0 = arith.constant 0 : i32
    %c0_i32_1 = arith.constant 0 : i32
    return %c0_i32, %c0_i32_0 : i32, i32
  }
  func.func @transform_13(%arg0: i32) -> (i32, i32) {
    %c0_i32 = arith.constant 0 : i32
    %c0_i32_0 = arith.constant 0 : i32
    %c0_i32_1 = arith.constant 0 : i32
    return %c0_i32, %c0_i32_0 : i32, i32
  }
  func.func @transform_14(%arg0: i32) -> (i32, i32) {
    %c0_i32 = arith.constant 0 : i32
    %c0_i32_0 = arith.constant 0 : i32
    %c0_i32_1 = arith.constant 0 : i32
    return %c0_i32, %c0_i32_0 : i32, i32
  }
  func.func @transform_15(%arg0: i32) -> (i32, i32) {
    %c0_i32 = arith.constant 0 : i32
    %c0_i32_0 = arith.constant 0 : i32
    %c0_i32_1 = arith.constant 0 : i32
    return %c0_i32, %c0_i32_0 : i32, i32
  }
  func.func @transform_16(%arg0: i32) -> (i32, i32) {
    %c0_i32 = arith.constant 0 : i32
    %c0_i32_0 = arith.constant 0 : i32
    %c0_i32_1 = arith.constant 0 : i32
    return %c0_i32, %c0_i32_0 : i32, i32
  }
  func.func @transform_17(%arg0: i32) -> (i32, i32) {
    %c0_i32 = arith.constant 0 : i32
    %c0_i32_0 = arith.constant 0 : i32
    %c0_i32_1 = arith.constant 0 : i32
    return %c0_i32, %c0_i32_0 : i32, i32
  }
  func.func @transform_18(%arg0: i32) -> (i32, i32) {
    %c0_i32 = arith.constant 0 : i32
    %c0_i32_0 = arith.constant 0 : i32
    %c0_i32_1 = arith.constant 0 : i32
    return %c0_i32, %c0_i32_0 : i32, i32
  }
  func.func @transform_19(%arg0: i32) -> (i32, i32) {
    %c0_i32 = arith.constant 0 : i32
    %c0_i32_0 = arith.constant 0 : i32
    %c0_i32_1 = arith.constant 0 : i32
    return %c0_i32, %c0_i32_0 : i32, i32
  }
  func.func @transform_20(%arg0: i32) -> (i32, i32) {
    %c0_i32 = arith.constant 0 : i32
    %c0_i32_0 = arith.constant 0 : i32
    %c0_i32_1 = arith.constant 0 : i32
    return %c0_i32, %c0_i32_0 : i32, i32
  }
  func.func @transform_21(%arg0: i32) -> (i32, i32) {
    %c0_i32 = arith.constant 0 : i32
    %c0_i32_0 = arith.constant 0 : i32
    %c0_i32_1 = arith.constant 0 : i32
    return %c0_i32, %c0_i32_0 : i32, i32
  }
  func.func @transform_22(%arg0: i32) -> (i32, i32) {
    %c0_i32 = arith.constant 0 : i32
    %c0_i32_0 = arith.constant 0 : i32
    %c0_i32_1 = arith.constant 0 : i32
    return %c0_i32, %c0_i32_0 : i32, i32
  }
  func.func @transform_23(%arg0: i32) -> (i32, i32) {
    %c0_i32 = arith.constant 0 : i32
    %c0_i32_0 = arith.constant 0 : i32
    %c0_i32_1 = arith.constant 0 : i32
    return %c0_i32, %c0_i32_0 : i32, i32
  }
  func.func @transform_24(%arg0: i32) -> (i32, i32) {
    %c0_i32 = arith.constant 0 : i32
    %c0_i32_0 = arith.constant 0 : i32
    %c0_i32_1 = arith.constant 0 : i32
    return %c0_i32, %c0_i32_0 : i32, i32
  }
  func.func @transform_25(%arg0: i32) -> (i32, i32) {
    %c0_i32 = arith.constant 0 : i32
    %c0_i32_0 = arith.constant 0 : i32
    %c0_i32_1 = arith.constant 0 : i32
    return %c0_i32, %c0_i32_0 : i32, i32
  }
}

</mosaic_0001>

<bundles_post_ra>
// kernel: tpu_custom_call.1
= control target key start
LH: loop header
LB: loop body
LE: loop exit
PB: predicated region body
PF: predicated region fallthrough
CT: control target
= control target key end

     0   :  { %s1582_s0 = inlined_call_operand.vmem [shape: f32[1,48], index: 0, kind: input, shape index: {}]   ;;  %s1583_s1 = inlined_call_operand.vmem [shape: f32[96,48], index: 1, kind: input, shape index: {}]   ;;  %s1584_s2 = inlined_call_operand.hbm [shape: f32[1,96], index: 2, kind: input, shape index: {}]   ;;  %s1585_s3 = inlined_call_operand.hbm [shape: f32[1,96], index: 3, kind: input, shape index: {}]   ;;  %s1586_s4 = inlined_call_operand.vmem [shape: f32[1,96], index: 4, kind: input, shape index: {}]   ;;  %s1587_s5 = inlined_call_operand.vmem [shape: f32[32,96], index: 5, kind: input, shape index: {}]   ;;  %s1588_s6 = inlined_call_operand.vmem [shape: f32[32,96], index: 6, kind: input, shape index: {}]   ;;  %s1589_s7 = inlined_call_operand.vmem [shape: f32[1,32], index: 7, kind: input, shape index: {}]   ;;  %s1590_s8 = inlined_call_operand.vmem [shape: f32[1,32], index: 8, kind: input, shape index: {}]   ;;  %s1591_s9 = inlined_call_operand.vmem [shape: f32[1,32], index: 9, kind: input, shape index: {}]   ;;  %s1592_s10 = inlined_call_operand.vmem [shape: f32[32,32], index: 10, kind: input, shape index: {}]   ;;  %s1593_s11 = inlined_call_operand.vmem [shape: f32[16,32], index: 11, kind: input, shape index: {}]   ;;  %s1594_s12 = inlined_call_operand.vmem [shape: f32[1,32], index: 12, kind: input, shape index: {}]   ;;  %s1595_s13 = inlined_call_operand.vmem [shape: f32[1,32], index: 13, kind: input, shape index: {}]   ;;  %s1596_s14 = inlined_call_operand.vmem [shape: f32[1,32], index: 14, kind: input, shape index: {}]   ;;  %s1597_s15 = inlined_call_operand.vmem [shape: f32[32,32], index: 15, kind: input, shape index: {}]   ;;  %s1598_s16 = inlined_call_operand.hbm [shape: f32[32,32], index: 16, kind: input, shape index: {}]   ;;  %s1599_s17 = inlined_call_operand.vmem [shape: f32[1,32], index: 17, kind: input, shape index: {}]   ;;  %s1600_s18 = inlined_call_operand.vmem [shape: f32[1,32], index: 18, kind: input, shape index: {}]   ;;  %s1601_s19 = inlined_call_operand.vmem [shape: f32[1,32], index: 19, kind: input, shape index: {}]   ;;  %s1602_s20 = inlined_call_operand.hbm [shape: f32[32,32], index: 20, kind: input, shape index: {}]   ;;  %s1603_s21 = inlined_call_operand.hbm [shape: f32[32,32], index: 21, kind: input, shape index: {}]   ;;  %s1604_s22 = inlined_call_operand.vmem [shape: f32[8,1], index: 22, kind: input, shape index: {}]   ;;  %s1605_s23 = inlined_call_operand.vmem [shape: f32[1,16], index: 23, kind: input, shape index: {}]   ;;  %s1606_s24 = inlined_call_operand.vmem [shape: f32[8,16], index: 24, kind: input, shape index: {}]   ;;  %s1607_s25 = inlined_call_operand.hbm [shape: f32[8,48], index: 25, kind: output, shape index: {}]  }
   0x1   :  { %1611 = sst [smem:[#allocation16_spill]] %s1582_s0 }
   0x2   :  { %1612 = sst [smem:[#allocation17_spill]] %s1583_s1 }
   0x3   :  { %1613 = sst [smem:[#allocation18_spill]] %s1584_s2 }
   0x4   :  { %1614 = sst [smem:[#allocation19_spill]] %s1585_s3 }
   0x5   :  { %1615 = sst [smem:[#allocation20_spill]] %s1586_s4 }
   0x6   :  { %1616 = sst [smem:[#allocation21_spill]] %s1587_s5 }
   0x7   :  { %1617 = sst [smem:[#allocation22_spill]] %s1588_s6 }
   0x8   :  { %1618 = sst [smem:[#allocation23_spill]] %s1589_s7 }
   0x9   :  { %1619 = sst [smem:[#allocation24_spill]] %s1590_s8 }
   0xa   :  { %1620 = sst [smem:[#allocation25_spill]] %s1591_s9 }
   0xb   :  { %1621 = sst [smem:[#allocation26_spill]] %s1607_s25 }
   0xc   :  { %30 = vsyncpa [#allocation3], 0 }
   0xd   :  { %31 = vsyncpa [#allocation6], 0 }
   0xe   :  { %32 = vsyncpa [#allocation9], 0  ;;  %s1622_s6 = sld [smem:[#allocation19_spill]] }
  0x14   :  { %s54_s30 = sshll.u32 %s1622_s6, 4  ;;  %s55_s30 = int_to_ptr.hbm [resolvable:$true] %s54_s30 }
  0x15   :  { %33 = vsyncpa [#allocation4], 0  ;;  %s1189_s7 = smov [#allocation5]   ;;  %s107_s8 = sshll.u32 %s1602_s20, 4  ;;  %s108_s8 = int_to_ptr.hbm [resolvable:$true] %s107_s8 }
  0x16   :  { %s56_s3 = sshll.u32 %s1189_s7, 4  ;;  %s1190_s27 = smov [#allocation8]   ;;  %s57_s3 = int_to_ptr.vmem [resolvable:$true] %s56_s3 }
  0x17   :  { %59 = dma.hbm_to_vmem [thread:$0]  %s55_s30, 16, %s57_s3, [#allocation6]  }
  0x18   :  { %s109_s4 = sshll.u32 %s1190_s27, 4  ;;  %s1623_s5 = sld [smem:[#allocation18_spill]]  ;;  %s110_s4 = int_to_ptr.vmem [resolvable:$true] %s109_s4 }
  0x19   :  { %s1191_s29 = smov 128   ;;  %s1192_s2 = smov 8  }
  0x1a   :  { %115 = dma.hbm_to_vmem [thread:$0]  %s108_s8, 512, %s110_s4, [#allocation9], %s1191_s29, %s1191_s29, %s1192_s2  }
  0x1b   :  { %s88_s30 = sshll.u32 %s1598_s16, 4  ;;  %s1193_s3 = smov [#allocation2]   ;;  %s89_s30 = int_to_ptr.hbm [resolvable:$true] %s88_s30 }
  0x1c   :  { %s45_s25 = sshll.u32 %s1193_s3, 4  ;;  %s1194_s20 = smov [#allocation7]   ;;  %s46_s25 = int_to_ptr.vmem [resolvable:$true] %s45_s25 }
  0x1d   :  { %s90_s26 = sshll.u32 %s1194_s20, 4  ;;  %s120_s28 = sshll.u32 %s1603_s21, 4  ;;  %s91_s26 = int_to_ptr.vmem [resolvable:$true] %s90_s26  ;;  %s121_s28 = int_to_ptr.hbm [resolvable:$true] %s120_s28 }
  0x1e   :  { %s43_s0 = sshll.u32 %s1623_s5, 4  ;;  %s1195_s9 = smov [#allocation10]   ;;  %s44_s0 = int_to_ptr.hbm [resolvable:$true] %s43_s0 }
  0x1f   :  { %48 = dma.hbm_to_vmem [thread:$0]  %s44_s0, 16, %s46_s25, [#allocation3]  }
  0x20   :  { %96 = dma.hbm_to_vmem [thread:$0]  %s89_s30, 512, %s91_s26, [#allocation6], %s1191_s29, %s1191_s29, %s1192_s2  }
  0x21   :  { %s122_s8 = sshll.u32 %s1195_s9, 4  ;;  %s123_s8 = int_to_ptr.vmem [resolvable:$true] %s122_s8 }
  0x22   :  { %128 = dma.hbm_to_vmem [thread:$0]  %s121_s28, 512, %s123_s8, [#allocation9], %s1191_s29, %s1191_s29, %s1192_s2  }
  0x23   :  { %1181 = dma.done.wait [#allocation3], 16  }
  0x24   :  { %1182 = vsyncadd [#allocation3], 4294967280 }
  0x25   :  { %1183 = dma.done.wait [#allocation6], 528  }
  0x26   :  { %1184 = vsyncadd [#allocation6], 4294966768 }
  0x27   :  { %1185 = dma.done.wait [#allocation9], 1024  }
  0x28   :  { %1186 = vsyncadd [#allocation9], 4294966272  ;;  %v1196_v0 = vmov 0   ;;  %v156_v1 = vld [vmem:[%s1604_s22] sm:$0xff]  ;;  %v1197_v17 = vmov 2102212464  }
  0x29   :  { %1008 = vset.pattern.permute.xlu0 %v1196_v0  ;;  %v1009_v2 = vld [vmem:[%s1605_s23] ss:$0 sm:$0xff]  ;;  %v1198_v19 = vmov 920167782   ;;  %v1199_v22 = vmov 1326507024  }
  0x2a   :  { %160 = vperm.xlu0 %1008, %v156_v1   ;;  %v1200_v24 = vmov 683565275   ;;  %v1201_v26 = vmov 2475754826   ;;  %v1202_v29 = vmov 2131351028  }
  0x2b   :  { %s1203_s22 = smov 16   ;;  %s1624_s5 = sld [smem:[#allocation21_spill]] }
  0x2c   :  { %s1625_s3 = sld [smem:[#allocation23_spill]]  ;;  %s1205_s30 = smov 32  }
  0x2d   :  { %s1629_s26 = sld [smem:[#allocation17_spill]] }
  0x2e   :  { %s1630_s6 = sld [smem:[#allocation20_spill]] }
  0x9c   :  { %v161_v3 = vpop.permute.xlu0 %160 }
  0x9d   :  { %v166_v4 = vmul.f32 %v1009_v2, %v161_v3 }
  0x9f   :  { %v1360_v5 = vmul.f32 1.5707964, %v166_v4 }
  0xa1   :  { %v171_v6 = vand.u32 2139095040, %v1360_v5  ;;  %v168_v9 = vand.u32 2147483647, %v1360_v5  ;;  %vm170_vm12 = vcmp.lt.s32.totalorder %v1360_v5, 0 }
  0xa3   :  { %v172_v7 = vshrl.u32 %v171_v6, 23  ;;  %v175_v11 = vand.u32 8388607, %v168_v9  ;;  %vm169_vm13 = vcmp.le.f32.partialorder %v168_v9, 0.7853982 }
  0xa5   :  { %v973_v8 = vadd.s32 4294967169, %v172_v7  ;;  %v176_v15 = vor.u32 8388608, %v175_v11 }
  0xa7   :  { %v178_v10 = vadd.s32 1, %v973_v8  ;;  %v1375_v36 = vshll.u32 %v176_v15, 8 }
  0xa9   :  { %vm179_vm0 = vcmp.gt.s32.totalorder %v178_v10, 0  ;;  %v217_v46 = vand.u32 65535, %v1375_v36  ;;  %v218_v48 = vshrl.u32 %v1375_v36, 16 }
  0xaa   :  { %v180_v12 = vsel %vm179_vm0, %v178_v10, 0 }
  0xab   :  { %v182_v13 = vand.u32 31, %v180_v12  ;;  %v1368_v16 = vshrl.u32 %v180_v12, 5 }
  0xad   :  { %v1366_v14 = vsub.s32 32, %v182_v13  ;;  %v194_v18 = vshll.u32 %v1197_v17, %v182_v13  ;;  %v197_v20 = vshll.u32 %v1198_v19, %v182_v13  ;;  %v185_v25 = vshll.u32 %v1200_v24, %v182_v13 }
  0xae   :  { %v188_v28 = vshll.u32 %v1201_v26, %v182_v13  ;;  %v191_v31 = vshll.u32 %v1202_v29, %v182_v13  ;;  %vm203_vm1 = vcmp.lt.s32.totalorder %v1368_v16, 4  ;;  %vm200_vm2 = vcmp.lt.s32.totalorder %v1368_v16, 1 }
  0xaf   :  { %v195_v21 = vshrl.u32 %v1198_v19, %v1366_v14  ;;  %v198_v23 = vshrl.u32 %v1199_v22, %v1366_v14  ;;  %v186_v27 = vshrl.u32 %v1201_v26, %v1366_v14  ;;  %v189_v30 = vshrl.u32 %v1202_v29, %v1366_v14 }
  0xb0   :  { %v192_v32 = vshrl.u32 %v1197_v17, %v1366_v14  ;;  %vm202_vm3 = vcmp.lt.s32.totalorder %v1368_v16, 3  ;;  %vm201_vm4 = vcmp.lt.s32.totalorder %v1368_v16, 2  ;;  %v184_v10 = vshrl.u32 %v1200_v24, %v1366_v14 }
  0xb1   :  { %v196_v33 = vor.u32 %v195_v21, %v194_v18  ;;  %v199_v34 = vor.u32 %v198_v23, %v197_v20  ;;  %v187_v35 = vor.u32 %v186_v27, %v185_v25  ;;  %v190_v37 = vor.u32 %v189_v30, %v188_v28 }
  0xb2   :  { %v193_v38 = vor.u32 %v192_v32, %v191_v31 }
  0xb3   :  { %v209_v39 = vsel %vm203_vm1, %v196_v33, 920167782  ;;  %v213_v40 = vsel %vm203_vm1, %v199_v34, 1326507024  ;;  %v208_v41 = vsel %vm200_vm2, %v187_v35, %v190_v37  ;;  %v204_v18 = vsel %vm200_vm2, %v184_v10, %v187_v35 }
  0xb4   :  { %v210_v42 = vsel %vm202_vm3, %v193_v38, %v209_v39  ;;  %v212_v43 = vsel %vm200_vm2, %v190_v37, %v193_v38  ;;  %v214_v45 = vsel %vm202_vm3, %v196_v33, %v213_v40  ;;  %v205_v6 = vsel %vm203_vm1, %v193_v38, 2102212464 }
  0xb5   :  { %v211_v44 = vsel %vm201_vm4, %v208_v41, %v210_v42  ;;  %v215_v47 = vsel %vm201_vm4, %v212_v43, %v214_v45  ;;  %v206_v19 = vsel %vm202_vm3, %v190_v37, %v205_v6 }
  0xb6   :  { %v241_v49 = vand.u32 65535, %v211_v44  ;;  %v242_v50 = vshrl.u32 %v211_v44, 16  ;;  %v219_v51 = vand.u32 65535, %v215_v47  ;;  %v220_v52 = vshrl.u32 %v215_v47, 16 }
  0xb7   :  { %v207_v24 = vsel %vm201_vm4, %v204_v18, %v206_v19  ;;  %vm311_vm4 = vweird.f32 %v1360_v5 }
  0xb8   :  { %v244_v53 = vmul.u32 %v242_v50, %v217_v46  ;;  %v245_v54 = vmul.u32 %v241_v49, %v218_v48  ;;  %v222_v55 = vmul.u32 %v220_v52, %v217_v46  ;;  %v223_v56 = vmul.u32 %v219_v51, %v218_v48 }
  0xb9   :  { %v243_v57 = vmul.u32 %v241_v49, %v217_v46  ;;  %v221_v59 = vmul.u32 %v219_v51, %v217_v46  ;;  %v246_v61 = vmul.u32 %v242_v50, %v218_v48  ;;  %v224_v62 = vmul.u32 %v220_v52, %v218_v48 }
  0xba   :  { %v247_v58 = vshll.u32 %v244_v53, 16  ;;  %v225_v60 = vshll.u32 %v222_v55, 16  ;;  %v249_v63 = vshll.u32 %v245_v54, 16  ;;  %v227_v2 = vshll.u32 %v223_v56, 16 }
  0xbb   :  { %v248_v15 = vshrl.u32 %v244_v53, 16  ;;  %v226_v20 = vshrl.u32 %v222_v55, 16  ;;  %v250_v22 = vshrl.u32 %v245_v54, 16  ;;  %v228_v25 = vshrl.u32 %v223_v56, 16 }
  0xbc   :  { %vm251_vm5 = vc.u32 %v243_v57, %v247_v58  ;;  %v253_v1 = vadd.s32 %v247_v58, %v243_v57  ;;  %vm229_vm6 = vc.u32 %v221_v59, %v225_v60  ;;  %v231_v3 = vadd.s32 %v225_v60, %v221_v59 }
  0xbd   :  { %v252_v4 = vsel %vm251_vm5, 1, %v1196_v0  ;;  %v230_v7 = vsel %vm229_vm6, 1, %v1196_v0  ;;  %v261_v29 = vmul.u32 %v1375_v36, %v207_v24  ;;  %v503_v24 = vld [vmem:[%s1593_s11] sm:$0xff]  ;;  %vm481_vm5 = vcmask 130048  }
  0xbe   :  { %v254_v8 = vadd.s32 %v252_v4, %v246_v61  ;;  %vm255_vm7 = vc.u32 %v253_v1, %v249_v63  ;;  %v232_v11 = vadd.s32 %v230_v7, %v224_v62  ;;  %vm233_vm8 = vc.u32 %v231_v3, %v227_v2 }
  0xbf   :  { %v256_v12 = vsel %vm255_vm7, 1, %v1196_v0  ;;  %v234_v13 = vsel %vm233_vm8, 1, %v1196_v0  ;;  %v257_v0 = vadd.s32 %v253_v1, %v249_v63 }
  0xc0   :  { %v258_v17 = vadd.s32 %v256_v12, %v254_v8  ;;  %v236_v21 = vadd.s32 %v234_v13, %v232_v11 }
  0xc2   :  { %v259_v23 = vadd.s32 %v258_v17, %v248_v15  ;;  %v237_v14 = vadd.s32 %v236_v21, %v226_v20 }
  0xc4   :  { %v260_v26 = vadd.s32 %v259_v23, %v250_v22  ;;  %v238_v27 = vadd.s32 %v237_v14, %v228_v25  ;;  %v504_v14 = vld [vmem:[%s1593_s11 + $0x8] sm:$0xff]  ;;  %s1626_s11 = sld [smem:[#allocation25_spill]] }
  0xc5   :  { %550 = vmatpush.msra.mxu2 %v504_v14 }
  0xc6   :  { %v264_v28 = vadd.s32 1, %v260_v26  ;;  %vm263_vm9 = vc.u32 %v238_v27, %v257_v0  ;;  %v262_v41 = vadd.s32 %v257_v0, %v238_v27  ;;  %v616_v27 = vld [vmem:[%s1597_s15 + $0x18] sm:$0xff]  ;;  %v507_v0 = vld [vmem:[%s1592_s10 + $0x10] sm:$0xff] }
  0xc7   :  { %551 = vmatpush.msra.mxu2 %v503_v24  ;;  %v609_v24 = vld [vmem:[#allocation7] sm:$0xff] }
  0xc8   :  { %v265_v30 = vsel %vm263_vm9, %v264_v28, %v260_v26  ;;  %v508_v26 = vld [vmem:[%s1592_s10 + $0x18] sm:$0xff]  ;;  %v615_v28 = vld [vmem:[%s1597_s15 + $0x10] sm:$0xff] }
  0xc9   :  { %v266_v31 = vadd.s32 %v265_v30, %v261_v29  ;;  %525 = vmatpush.msra.mxu0 %v508_v26  ;;  %629 = vmatpush.msrb.mxu2 %v616_v27  ;;  %v506_v29 = vld [vmem:[%s1592_s10 + $0x8] sm:$0xff] }
  0xca   :  { %v614_v30 = vld [vmem:[%s1597_s15 + $0x8] sm:$0xff] }
  0xcb   :  { %v267_v32 = vadd.s32 536870912, %v266_v31  ;;  %526 = vmatpush.msra.mxu0 %v507_v0  ;;  %630 = vmatpush.msrb.mxu2 %v615_v28 }
  0xcd   :  { %v268_v33 = vshrl.u32 %v267_v32, 30  ;;  %v613_v32 = vld [vmem:[%s1597_s15] sm:$0xff]  ;;  %527 = vmatpush.msra.mxu0 %v506_v29  ;;  %631 = vmatpush.msrb.mxu2 %v614_v30 }
  0xcf   :  { %v269_v34 = vshll.u32 %v268_v33, 30  ;;  %v292_v53 = vsub.s32 4, %v268_v33  ;;  %632 = vmatpush.msrb.mxu2 %v613_v32 }
  0xd1   :  { %v270_v35 = vsub.s32 %v266_v31, %v269_v34  ;;  %v293_v57 = vsel %vm170_vm12, %v292_v53, %v268_v33  ;;  %v505_v31 = vld [vmem:[%s1592_s10] sm:$0xff] }
  0xd2   :  { %v295_v60 = vsel %vm169_vm13, 0, %v293_v57  ;;  %v714_v34 = vld [vmem:[#allocation8 + $0x18] sm:$0xff]  ;;  %528 = vmatpush.msra.mxu0 %v505_v31 }
  0xd3   :  { %vm271_vm10 = vcmp.lt.s32.totalorder %v270_v35, 0  ;;  %v272_v37 = vsub.s32 0, %v270_v35  ;;  %v312_v2 = vadd.s32 3, %v295_v60  ;;  %v467_v11 = vand.u32 3, %v295_v60 }
  0xd4   :  { %727 = vmatpush.msrb.mxu0 %v714_v34  ;;  %v1011_v34 = vld [vmem:[%s1626_s11] ss:$0 sm:$0xff] }
  0xd5   :  { %v273_v38 = vsel %vm271_vm10, %v272_v37, %v270_v35  ;;  %v313_v8 = vand.u32 3, %v312_v2  ;;  %vm468_vm0 = vcmp.lt.s32.totalorder %v467_v11, 2  ;;  %vm469_vm1 = vcmp.eq.s32.totalorder %v467_v11, 0 }
  0xd6   :  { %v274_v39 = vclz %v273_v38  ;;  %vm472_vm2 = vcmp.eq.s32.totalorder %v467_v11, 2  ;;  %vm509_vm10 = vcmask 261120  }
  0xd7   :  { %vm318_vm14 = vcmp.eq.s32.totalorder %v313_v8, 2  ;;  %vm315_vm15 = vcmp.eq.s32.totalorder %v313_v8, 0  ;;  %vm314_vm3 = vcmp.lt.s32.totalorder %v313_v8, 2 }
  0xd8   :  { %v974_v40 = vadd.s32 4294967294, %v274_v39  ;;  %v713_v39 = vld [vmem:[#allocation8 + $0x10] sm:$0xff] }
  0xd9   :  { %728 = vmatpush.msrb.mxu0 %v713_v39 }
  0xda   :  { %vm975_vm11 = vcmp.lt.s32.totalorder %v974_v40, 0 }
  0xdb   :  { %v277_v16 = vsel %vm975_vm11, 0, %v974_v40  ;;  %v811_v40 = vld [vmem:[%s1624_s5 + $0x10] sm:$0xff] }
  0xdc   :  { %v278_v42 = vsub.s32 32, %v277_v16  ;;  %v282_v43 = vsub.s32 4294967266, %v277_v16  ;;  %v279_v44 = vshll.u32 %v270_v35, %v277_v16  ;;  %v812_v35 = vld [vmem:[%s1624_s5 + $0x18] sm:$0xff]  ;;  %v712_v16 = vld [vmem:[#allocation8 + $0x8] sm:$0xff] }
  0xdd   :  { %729 = vmatpush.msrb.mxu0 %v712_v16 }
  0xde   :  { %v280_v45 = vshrl.u32 %v262_v41, %v278_v42  ;;  %v283_v36 = vadd.s32 127, %v282_v43  ;;  %v810_v41 = vld [vmem:[%s1624_s5 + $0x8] sm:$0xff]  ;;  %v809_v43 = vld [vmem:[%s1624_s5] sm:$0xff] }
  0xdf   :  { %v711_v42 = vld [vmem:[#allocation8] sm:$0xff] }
  0xe0   :  { %v281_v46 = vor.u32 %v280_v45, %v279_v44  ;;  %v284_v47 = vshll.u32 %v283_v36, 23  ;;  %730 = vmatpush.msrb.mxu0 %v711_v42 }
  0xe2   :  { %v285_v48 = vor.u32 4788187, %v284_v47  ;;  %v288_v50 = vcvt.s32.f32 %v281_v46 }
  0xe4   :  { %v286_v49 = vand.u32 2147483647, %v285_v48 }
  0xe6   :  { %v289_v51 = vmul.f32 %v288_v50, %v286_v49 }
  0xe8   :  { %v290_v52 = vxor.u32 2147483648, %v289_v51 }
  0xea   :  { %v291_v54 = vsel %vm170_vm12, %v290_v52, %v289_v51 }
  0xeb   :  { %v294_v55 = vsel %vm169_vm13, %v1360_v5, %v291_v54  ;;  %v155_v5 = vld [vmem:[%s1606_s24] sm:$0xff]  ;;  %s1627_s24 = sld [smem:[#allocation24_spill]] }
  0xec   :  { %v296_v56 = vmul.f32 %v294_v55, %v294_v55  ;;  %981 = vmatmul.msk.f32.vlgmr.msra.gmra.mxu2 %vm481_vm5, %v155_v5 }
  0xed   :  { %825 = vmatpush.msra.mxu2 %v812_v35 }
  0xee   :  { %v297_v58 = vmul.f32 -0.001358992, %v296_v56  ;;  %v304_v59 = vmul.f32 -0.00019511016, %v296_v56 }
  0xef   :  { %826 = vmatpush.msra.mxu2 %v811_v40 }
  0xf0   :  { %v298_v61 = vadd.f32 0.041655596, %v297_v58  ;;  %v305_v62 = vadd.f32 0.008332121, %v304_v59  ;;  %v1010_v58 = vld [vmem:[%s1625_s3] ss:$0 sm:$0xff] }
  0xf1   :  { %827 = vmatpush.msra.mxu2 %v810_v41  ;;  %v1013_v41 = vld [vmem:[%s1594_s12] ss:$0 sm:$0xff]  ;;  %s1206_s3 = smov 64  }
  0xf2   :  { %v299_v63 = vmul.f32 %v298_v61, %v296_v56  ;;  %v306_v1 = vmul.f32 %v305_v62, %v296_v56 }
  0xf3   :  { %828 = vmatpush.msra.mxu2 %v809_v43 }
  0xf4   :  { %v300_v3 = vadd.f32 -0.4999988, %v299_v63  ;;  %v307_v4 = vadd.f32 -0.16666654, %v306_v1 }
  0xf6   :  { %v301_v6 = vmul.f32 %v300_v3, %v296_v56  ;;  %v308_v7 = vmul.f32 %v307_v4, %v296_v56  ;;  %v1204_v56 = vmov 8.0  }
  0xf8   :  { %v302_v10 = vadd.f32 1.0, %v301_v6  ;;  %v309_v9 = vadd.f32 1.0, %v308_v7 }
  0xfa   :  { %v310_v12 = vmul.f32 %v309_v9, %v294_v55  ;;  %v319_v13 = vxor.u32 2147483648, %v302_v10 }
  0xfc   :  { %v316_v15 = vxor.u32 2147483648, %v310_v12  ;;  %v320_v17 = vsel %vm318_vm14, %v319_v13, %v310_v12  ;;  %v474_v19 = vsel %vm472_vm2, %v319_v13, %v310_v12 }
  0xfe   :  { %v471_v18 = vsel %vm469_vm1, %v302_v10, %v316_v15  ;;  %v317_v20 = vsel %vm315_vm15, %v302_v10, %v316_v15 }
  0xff   :  { %v475_v21 = vsel %vm468_vm0, %v471_v18, %v474_v19  ;;  %v321_v22 = vsel %vm314_vm3, %v317_v20, %v320_v17 }
 0x100   :  { %v476_v23 = vsel %vm311_vm4, nan, %v475_v21  ;;  %v322_v25 = vsel %vm311_vm4, nan, %v321_v22  ;;  %v612_v21 = vld [vmem:[#allocation7 + $0x18] sm:$0xff]  ;;  %v611_v22 = vld [vmem:[#allocation7 + $0x10] sm:$0xff] }
 0x101   :  { %478 = vrot.lane.b32.xlu0 %v476_v23, %s1203_s22  ;;  %652 = vmatpush.msra.mxu3 %v612_v21 }
 0x103   :  { %653 = vmatpush.msra.mxu3 %v611_v22 }
 0x16f   :  { %v553_v60 = vpop.f32.mrf.mxu2 }
 0x173   :  { %v479_v33 = vpop.permute.xlu0 %478 }
 0x174   :  { %v482_v37 = vsel %vm481_vm5, %v322_v25, %v479_v33  ;;  %v610_v25 = vld [vmem:[#allocation7 + $0x8] sm:$0xff]  ;;  %vm863_vm5 = vcmask 785408  }
 0x175   :  { %v979_v38 = vmul.f32 -1.442695, %v482_v37  ;;  %654 = vmatpush.msra.mxu3 %v610_v25  ;;  %v1016_v25 = vld [vmem:[%s1599_s17] ss:$0 sm:$0xff]  ;;  %s1628_s17 = sld [smem:[#allocation22_spill]] }
 0x177   :  { %1023 = vpow2.f32 %v979_v38  ;;  %655 = vmatpush.msra.mxu3 %v609_v24  ;;  %v1012_v38 = vld [vmem:[%s1627_s24] ss:$0 sm:$0xff] }
 0x17d   :  { %v1024_v44 = vpop.eup %1023 }
 0x17e   :  { %v486_v45 = vadd.f32 1.0, %v1024_v44 }
 0x180   :  { %1025 = vrcp.f32 %v486_v45  ;;  %v498_v48 = vand.u32 2147483648, %v486_v45  ;;  %v496_v50 = vand.u32 2147483647, %v486_v45  ;;  %vm492_vm7 = vweird.f32 %v486_v45 }
 0x181   :  { %1027 = vrcp.f32 %v1204_v56 }
 0x182   :  { %v499_v52 = vor.u32 1.1754944e-38, %v498_v48  ;;  %vm497_vm9 = vcmp.eq.f32.partialorder %v496_v50, 8.507059e+37 }
 0x186   :  { %v1026_v36 = vpop.eup %1025 }
 0x187   :  { %v488_v46 = vmul.f32 %v1026_v36, %v486_v45  ;;  %vm493_vm6 = vweird.f32 %v1026_v36  ;;  %v1028_v57 = vpop.eup %1027 }
 0x188   :  { %vm494_vm8 = vmor %vm492_vm7, %vm493_vm6  ;;  %v571_v59 = vmul.f32 8.0, %v1028_v57  ;;  %vm575_vm11 = vweird.f32 %v1028_v57 }
 0x189   :  { %v489_v47 = vsub.f32 1.0, %v488_v46 }
 0x18a   :  { %v572_v1 = vsub.f32 1.0, %v571_v59 }
 0x18b   :  { %v490_v49 = vmul.f32 %v1026_v36, %v489_v47 }
 0x18c   :  { %v573_v4 = vmul.f32 %v1028_v57, %v572_v1 }
 0x18d   :  { %v491_v51 = vadd.f32 %v1026_v36, %v490_v49 }
 0x18e   :  { %v574_v8 = vadd.f32 %v1028_v57, %v573_v4 }
 0x18f   :  { %v495_v53 = vsel %vm494_vm8, %v1026_v36, %v491_v51 }
 0x190   :  { %v500_v54 = vsel %vm497_vm9, %v499_v52, %v495_v53  ;;  %v1473_v11 = vsel %vm575_vm11, %v1028_v57, %v574_v8  ;;  %vm910_vm9 = vcmask 523264   ;;  %vm952_vm11 = vcmask 392192  }
 0x191   :  { %v502_v55 = vmul.f32 %v500_v54, %v482_v37 }
 0x193   :  { %980 = vmatmul.msk.f32.vlgmr.msra.gmra.mxu0 %vm509_vm10, %v502_v55  ;;  %982 = vmatmul.msk.f32.vlgmr.msrb.gmra.mxu2 %vm509_vm10, %v502_v55 }
 0x19b   :  { %984 = vmatmul.msk.f32.vlgmr.msrb.gmra.mxu0 %vm509_vm10, %v502_v55  ;;  %986 = vmatmul.msk.f32.vlgmr.msra.gmra.mxu2 %vm509_vm10, %v502_v55 }
 0x210   :  { %v530_v61 = vpop.f32.mrf.mxu0 }
 0x211   :  { %v554_v62 = vadd.f32 %v553_v60, %v530_v61  ;;  %v710_v60 = vld [vmem:[#allocation10 + $0x18] sm:$0xff] }
 0x212   :  { %750 = vmatpush.msra.mxu0 %v710_v60 }
 0x213   :  { %v560_v63 = vadd.f32 %v1010_v58, %v554_v62  ;;  %v709_v62 = vld [vmem:[#allocation10 + $0x10] sm:$0xff] }
 0x214   :  { %751 = vmatpush.msra.mxu0 %v709_v62  ;;  %v923_v62 = vld [vmem:[%s1629_s26 + $0x50] sm:$0xff] }
 0x215   :  { %v563_v2 = vsel %vm509_vm10, %v560_v63, 0.0 }
 0x216   :  { %v564_v3 = vrot.slane %v563_v2, 4  ;;  %v634_v42 = vpop.f32.mrf.mxu2 }
 0x218   :  { %v565_v6 = vadd.f32 %v564_v3, %v563_v2  ;;  %v707_v2 = vld [vmem:[#allocation10] sm:$0xff] }
 0x21a   :  { %v566_v7 = vrot.slane %v565_v6, 2 }
 0x21c   :  { %v567_v10 = vadd.f32 %v566_v7, %v565_v6 }
 0x21e   :  { %v568_v9 = vrot.slane %v567_v10, 1 }
 0x220   :  { %v569_v12 = vadd.f32 %v568_v9, %v567_v10 }
 0x222   :  { %v577_v13 = vmul.f32 %v1473_v11, %v569_v12 }
 0x224   :  { %v578_v15 = vsub.f32 %v560_v63, %v577_v13  ;;  %v708_v63 = vld [vmem:[#allocation10 + $0x8] sm:$0xff]  ;;  %v1014_v13 = vld [vmem:[%s1596_s14] ss:$0 sm:$0xff] }
 0x225   :  { %752 = vmatpush.msra.mxu0 %v708_v63  ;;  %v922_v63 = vld [vmem:[%s1629_s26 + $0x48] sm:$0xff] }
 0x226   :  { %v579_v17 = vmul.f32 %v578_v15, %v578_v15 }
 0x227   :  { %753 = vmatpush.msra.mxu0 %v707_v2  ;;  %v920_v2 = vld [vmem:[%s1629_s26 + $0x38] sm:$0xff] }
 0x228   :  { %v580_v18 = vsel %vm509_vm10, %v579_v17, 0.0 }
 0x229   :  { %v581_v19 = vrot.slane %v580_v18, 4 }
 0x22b   :  { %v582_v20 = vadd.f32 %v581_v19, %v580_v18  ;;  %v1015_v18 = vld [vmem:[%s1595_s13] ss:$0 sm:$0xff] }
 0x22d   :  { %v583_v23 = vrot.slane %v582_v20, 2 }
 0x22f   :  { %v584_v14 = vadd.f32 %v583_v23, %v582_v20  ;;  %v732_v23 = vpop.f32.mrf.mxu0 }
 0x231   :  { %v585_v5 = vrot.slane %v584_v14, 1 }
 0x233   :  { %v586_v26 = vadd.f32 %v585_v5, %v584_v14 }
 0x235   :  { %v587_v27 = vmul.f32 %v586_v26, %v1473_v11 }
 0x237   :  { %v588_v0 = vadd.f32 1e-05, %v587_v27 }
 0x239   :  { %1029 = vrsqrt.f32 %v588_v0  ;;  %vm595_vm13 = vweird.f32 %v588_v0 }
 0x23f   :  { %v1030_v28 = vpop.eup %1029 }
 0x240   :  { %v590_v29 = vmul.f32 %v1030_v28, %v588_v0  ;;  %vm596_vm12 = vweird.f32 %v1030_v28 }
 0x241   :  { %vm597_vm14 = vmor %vm595_vm13, %vm596_vm12 }
 0x242   :  { %v591_v30 = vmul.f32 %v1030_v28, %v590_v29 }
 0x244   :  { %v592_v31 = vmul.f32 0.5, %v591_v30 }
 0x246   :  { %v593_v32 = vsub.f32 1.5, %v592_v31 }
 0x248   :  { %v594_v33 = vmul.f32 %v1030_v28, %v593_v32 }
 0x24a   :  { %v598_v35 = vsel %vm597_vm14, %v1030_v28, %v594_v33 }
 0x24b   :  { %v599_v37 = vmul.f32 %v598_v35, %v578_v15 }
 0x24d   :  { %v603_v39 = vmul.f32 %v1011_v34, %v599_v37 }
 0x24f   :  { %v607_v40 = vadd.f32 %v1012_v38, %v603_v39 }
 0x251   :  { %v608_v16 = vmax.f32 %v607_v40, 0.0  ;;  %v808_v40 = vld [vmem:[%s1628_s17 + $0x18] sm:$0xff] }
 0x252   :  { %848 = vmatpush.msrb.mxu3 %v808_v40 }
 0x253   :  { %983 = vmatmul.msk.f32.vlgmr.msra.gmra.mxu3 %vm509_vm10, %v608_v16 }
 0x2d6   :  { %v657_v43 = vpop.f32.mrf.mxu3 }
 0x2d7   :  { %v658_v44 = vadd.f32 %v657_v43, %v634_v42  ;;  %v806_v42 = vld [vmem:[%s1628_s17 + $0x8] sm:$0xff] }
 0x2d9   :  { %v664_v45 = vadd.f32 %v1013_v41, %v658_v44  ;;  %v805_v44 = vld [vmem:[%s1628_s17] sm:$0xff] }
 0x2db   :  { %v667_v36 = vsel %vm509_vm10, %v664_v45, 0.0 }
 0x2dc   :  { %v668_v46 = vrot.slane %v667_v36, 4 }
 0x2de   :  { %v669_v47 = vadd.f32 %v668_v46, %v667_v36 }
 0x2e0   :  { %v670_v48 = vrot.slane %v669_v47, 2 }
 0x2e2   :  { %v671_v49 = vadd.f32 %v670_v48, %v669_v47 }
 0x2e4   :  { %v672_v50 = vrot.slane %v671_v49, 1 }
 0x2e6   :  { %v673_v51 = vadd.f32 %v672_v50, %v671_v49 }
 0x2e8   :  { %v674_v52 = vmul.f32 %v673_v51, %v1473_v11 }
 0x2ea   :  { %v675_v53 = vsub.f32 %v664_v45, %v674_v52 }
 0x2ec   :  { %v676_v54 = vmul.f32 %v675_v53, %v675_v53 }
 0x2ee   :  { %v677_v55 = vsel %vm509_vm10, %v676_v54, 0.0 }
 0x2ef   :  { %v678_v56 = vrot.slane %v677_v55, 4 }
 0x2f1   :  { %v679_v57 = vadd.f32 %v678_v56, %v677_v55  ;;  %v1018_v56 = vld [vmem:[%s1600_s18] ss:$0 sm:$0xff]  ;;  %s1632_s18 = sld [smem:[#allocation26_spill]] }
 0x2f3   :  { %v680_v58 = vrot.slane %v679_v57, 2 }
 0x2f5   :  { %v681_v59 = vadd.f32 %v680_v58, %v679_v57 }
 0x2f7   :  { %v682_v61 = vrot.slane %v681_v59, 1  ;;  %s961_s1 = sshll.u32 %s1632_s18, 4  ;;  %s962_s1 = int_to_ptr.hbm [resolvable:$true] %s961_s1 }
 0x2f9   :  { %v683_v1 = vadd.f32 %v682_v61, %v681_v59  ;;  %v924_v61 = vld [vmem:[%s1629_s26 + $0x58] sm:$0xff] }
 0x2fa   :  { %936 = vmatpush.msra.mxu1 %v924_v61 }
 0x2fb   :  { %v684_v3 = vmul.f32 %v683_v1, %v1473_v11  ;;  %v921_v1 = vld [vmem:[%s1629_s26 + $0x40] sm:$0xff] }
 0x2fc   :  { %937 = vmatpush.msra.mxu1 %v923_v62 }
 0x2fd   :  { %v685_v4 = vadd.f32 1e-05, %v684_v3  ;;  %v919_v3 = vld [vmem:[%s1629_s26 + $0x30] sm:$0xff] }
 0x2fe   :  { %938 = vmatpush.msra.mxu1 %v922_v63 }
 0x2ff   :  { %1031 = vrsqrt.f32 %v685_v4  ;;  %vm692_vm0 = vweird.f32 %v685_v4 }
 0x300   :  { %939 = vmatpush.msra.mxu1 %v921_v1 }
 0x302   :  { %940 = vmatpush.msra.mxu1 %v920_v2 }
 0x304   :  { %941 = vmatpush.msra.mxu1 %v919_v3 }
 0x305   :  { %v1032_v6 = vpop.eup %1031 }
 0x306   :  { %v687_v7 = vmul.f32 %v1032_v6, %v685_v4  ;;  %vm693_vm15 = vweird.f32 %v1032_v6  ;;  %v918_v4 = vld [vmem:[%s1629_s26 + $0x28] sm:$0xff] }
 0x307   :  { %vm694_vm1 = vmor %vm692_vm0, %vm693_vm15  ;;  %942 = vmatpush.msra.mxu1 %v918_v4 }
 0x308   :  { %v688_v8 = vmul.f32 %v1032_v6, %v687_v7  ;;  %v916_v7 = vld [vmem:[%s1629_s26 + $0x18] sm:$0xff] }
 0x30a   :  { %v689_v10 = vmul.f32 0.5, %v688_v8  ;;  %v915_v8 = vld [vmem:[%s1629_s26 + $0x10] sm:$0xff] }
 0x30c   :  { %v690_v9 = vsub.f32 1.5, %v689_v10  ;;  %v914_v10 = vld [vmem:[%s1629_s26 + $0x8] sm:$0xff] }
 0x30e   :  { %v691_v12 = vmul.f32 %v1032_v6, %v690_v9  ;;  %v913_v9 = vld [vmem:[%s1629_s26] sm:$0xff] }
 0x310   :  { %v695_v15 = vsel %vm694_vm1, %v1032_v6, %v691_v12  ;;  %v917_v6 = vld [vmem:[%s1629_s26 + $0x20] sm:$0xff] }
 0x311   :  { %v696_v17 = vmul.f32 %v695_v15, %v675_v53  ;;  %v1017_v53 = vld [vmem:[%s1601_s19] ss:$0 sm:$0xff]  ;;  %943 = vmatpush.msra.mxu1 %v917_v6  ;;  %s1207_s19 = smov [#allocation11]  }
 0x312   :  { %v1019_v12 = vld [vmem:[#allocation2] ss:$0 sm:$0xff]  ;;  %s959_s20 = sshll.u32 %s1207_s19, 4  ;;  %s960_s20 = int_to_ptr.vmem [resolvable:$true] %s959_s20 }
 0x313   :  { %v700_v19 = vmul.f32 %v1014_v13, %v696_v17  ;;  %944 = vmatpush.msra.mxu1 %v916_v7  ;;  %v830_v13 = vpop.f32.mrf.mxu2 }
 0x315   :  { %v704_v20 = vadd.f32 %v1015_v18, %v700_v19  ;;  %945 = vmatpush.msra.mxu1 %v915_v8 }
 0x317   :  { %v705_v21 = vmax.f32 %v704_v20, 0.0  ;;  %946 = vmatpush.msra.mxu1 %v914_v10 }
 0x319   :  { %v706_v22 = vadd.f32 %v705_v21, %v608_v16  ;;  %v807_v16 = vld [vmem:[%s1628_s17 + $0x10] sm:$0xff]  ;;  %947 = vmatpush.msra.mxu1 %v913_v9 }
 0x31a   :  { %849 = vmatpush.msrb.mxu3 %v807_v16 }
 0x31b   :  { %985 = vmatmul.msk.f32.vlgmr.msra.gmra.mxu0 %vm509_vm10, %v706_v22 }
 0x31c   :  { %850 = vmatpush.msrb.mxu3 %v806_v42  ;;  %v1020_v42 = vld [vmem:[%s1630_s6] ss:$0 sm:$0xff] }
 0x31e   :  { %851 = vmatpush.msrb.mxu3 %v805_v44 }
 0x398   :  { %v755_v14 = vpop.f32.mrf.mxu0 }
 0x399   :  { %v756_v24 = vadd.f32 %v755_v14, %v732_v23 }
 0x39b   :  { %v762_v5 = vadd.f32 %v1016_v25, %v756_v24 }
 0x39d   :  { %v765_v26 = vsel %vm509_vm10, %v762_v5, 0.0 }
 0x39e   :  { %v766_v27 = vrot.slane %v765_v26, 4 }
 0x3a0   :  { %v767_v0 = vadd.f32 %v766_v27, %v765_v26 }
 0x3a2   :  { %v768_v28 = vrot.slane %v767_v0, 2 }
 0x3a4   :  { %v769_v29 = vadd.f32 %v768_v28, %v767_v0 }
 0x3a6   :  { %v770_v30 = vrot.slane %v769_v29, 1 }
 0x3a8   :  { %v771_v31 = vadd.f32 %v770_v30, %v769_v29 }
 0x3aa   :  { %v772_v32 = vmul.f32 %v771_v31, %v1473_v11 }
 0x3ac   :  { %v773_v33 = vsub.f32 %v762_v5, %v772_v32 }
 0x3ae   :  { %v774_v34 = vmul.f32 %v773_v33, %v773_v33 }
 0x3b0   :  { %v775_v35 = vsel %vm509_vm10, %v774_v34, 0.0 }
 0x3b1   :  { %v776_v37 = vrot.slane %v775_v35, 4 }
 0x3b3   :  { %v777_v38 = vadd.f32 %v776_v37, %v775_v35 }
 0x3b5   :  { %v778_v39 = vrot.slane %v777_v38, 2 }
 0x3b7   :  { %v779_v41 = vadd.f32 %v778_v39, %v777_v38 }
 0x3b9   :  { %v780_v43 = vrot.slane %v779_v41, 1 }
 0x3bb   :  { %v781_v45 = vadd.f32 %v780_v43, %v779_v41 }
 0x3bd   :  { %v782_v36 = vmul.f32 %v781_v45, %v1473_v11  ;;  %v1021_v45 = vld [vmem:[#allocation5] ss:$0 sm:$0xff] }
 0x3bf   :  { %v783_v46 = vadd.f32 1e-05, %v782_v36 }
 0x3c1   :  { %1033 = vrsqrt.f32 %v783_v46  ;;  %vm790_vm3 = vweird.f32 %v783_v46 }
 0x3c7   :  { %v1034_v47 = vpop.eup %1033 }
 0x3c8   :  { %v785_v48 = vmul.f32 %v1034_v47, %v783_v46  ;;  %vm791_vm2 = vweird.f32 %v1034_v47 }
 0x3c9   :  { %vm792_vm4 = vmor %vm790_vm3, %vm791_vm2 }
 0x3ca   :  { %v786_v49 = vmul.f32 %v1034_v47, %v785_v48 }
 0x3cc   :  { %v787_v50 = vmul.f32 0.5, %v786_v49 }
 0x3ce   :  { %v788_v51 = vsub.f32 1.5, %v787_v50 }
 0x3d0   :  { %v789_v52 = vmul.f32 %v1034_v47, %v788_v51 }
 0x3d2   :  { %v793_v54 = vsel %vm792_vm4, %v1034_v47, %v789_v52 }
 0x3d3   :  { %v794_v55 = vmul.f32 %v793_v54, %v773_v33 }
 0x3d5   :  { %v798_v57 = vmul.f32 %v1017_v53, %v794_v55 }
 0x3d7   :  { %v802_v58 = vadd.f32 %v1018_v56, %v798_v57 }
 0x3d9   :  { %v803_v59 = vmax.f32 %v802_v58, 0.0 }
 0x3db   :  { %v1524_v60 = vadd.f32 %v803_v59, %v706_v22 }
 0x3dd   :  { %903 = vrot.lane.b32.xlu1 %v1524_v60, %s1205_s30  ;;  %987 = vmatmul.msk.f32.vlgmr.msrb.gmra.mxu3 %vm509_vm10, %v1524_v60 }
 0x3e5   :  { %906 = vrot.lane.b32.xlu1 %v1524_v60, %s1206_s3  ;;  %s1631_s3 = sld [smem:[#allocation16_spill]] }
 0x3eb   :  { %v1022_v51 = vld [vmem:[%s1631_s3] ss:$0 sm:$0xff] }
 0x44f   :  { %v904_v40 = vpop.permute.xlu1 %903 }
 0x450   :  { %v909_v47 = vsel %vm509_vm10, %v1524_v60, %v904_v40 }
 0x457   :  { %v907_v36 = vpop.permute.xlu1 %906 }
 0x458   :  { %v911_v49 = vsel %vm910_vm9, %v909_v47, %v907_v36 }
 0x460   :  { %v853_v15 = vpop.f32.mrf.mxu3 }
 0x461   :  { %v854_v17 = vadd.f32 %v853_v15, %v830_v13 }
 0x463   :  { %v860_v18 = vadd.f32 %v1019_v12, %v854_v17 }
 0x465   :  { %v864_v19 = vsel %vm863_vm5, %v860_v18, 0.0 }
 0x466   :  { %v865_v20 = vrot.slane %v864_v19, 4 }
 0x468   :  { %v866_v21 = vadd.f32 %v865_v20, %v864_v19 }
 0x46a   :  { %v867_v22 = vrot.slane %v866_v21, 2 }
 0x46c   :  { %v868_v23 = vadd.f32 %v867_v22, %v866_v21 }
 0x46e   :  { %v869_v25 = vrot.slane %v868_v23, 1 }
 0x470   :  { %v870_v14 = vadd.f32 %v869_v25, %v868_v23 }
 0x472   :  { %v871_v24 = vmul.f32 %v870_v14, %v1473_v11 }
 0x474   :  { %v872_v5 = vsub.f32 %v860_v18, %v871_v24 }
 0x476   :  { %v873_v26 = vmul.f32 %v872_v5, %v872_v5 }
 0x478   :  { %v874_v27 = vsel %vm863_vm5, %v873_v26, 0.0 }
 0x479   :  { %v875_v0 = vrot.slane %v874_v27, 4 }
 0x47b   :  { %v876_v28 = vadd.f32 %v875_v0, %v874_v27 }
 0x47d   :  { %v877_v29 = vrot.slane %v876_v28, 2 }
 0x47f   :  { %v878_v30 = vadd.f32 %v877_v29, %v876_v28 }
 0x481   :  { %v879_v31 = vrot.slane %v878_v30, 1 }
 0x483   :  { %v880_v32 = vadd.f32 %v879_v31, %v878_v30 }
 0x485   :  { %v881_v33 = vmul.f32 %v880_v32, %v1473_v11 }
 0x487   :  { %v882_v34 = vadd.f32 1e-05, %v881_v33 }
 0x489   :  { %1035 = vrsqrt.f32 %v882_v34  ;;  %vm889_vm7 = vweird.f32 %v882_v34 }
 0x48f   :  { %v1036_v35 = vpop.eup %1035 }
 0x490   :  { %v884_v37 = vmul.f32 %v1036_v35, %v882_v34  ;;  %vm890_vm6 = vweird.f32 %v1036_v35 }
 0x491   :  { %vm891_vm8 = vmor %vm889_vm7, %vm890_vm6 }
 0x492   :  { %v885_v38 = vmul.f32 %v1036_v35, %v884_v37 }
 0x494   :  { %v886_v39 = vmul.f32 0.5, %v885_v38 }
 0x496   :  { %v887_v16 = vsub.f32 1.5, %v886_v39 }
 0x498   :  { %v888_v41 = vmul.f32 %v1036_v35, %v887_v16 }
 0x49a   :  { %v892_v43 = vsel %vm891_vm8, %v1036_v35, %v888_v41 }
 0x49b   :  { %v893_v44 = vmul.f32 %v892_v43, %v872_v5 }
 0x49d   :  { %v897_v11 = vmul.f32 %v1020_v42, %v893_v44 }
 0x49f   :  { %v901_v46 = vadd.f32 %v1021_v45, %v897_v11 }
 0x4a1   :  { %v902_v48 = vmax.f32 %v901_v46, 0.0 }
 0x4a3   :  { %v912_v50 = vadd.f32 %v911_v49, %v902_v48 }
 0x4a5   :  { %988 = vmatmul.msk.f32.vlgmr.msra.gmra.mxu1 %vm863_vm5, %v912_v50 }
 0x522   :  { %v949_v52 = vpop.f32.mrf.mxu1 }
 0x523   :  { %v950_v53 = vadd.f32 %v1022_v51, %v949_v52 }
 0x525   :  { %953 = vst.msk [vmem:[#allocation11] sm:$0xff] %vm952_vm11, %v950_v53 }
 0x526   :  { %964 = dma.vmem_to_hbm [thread:$0]  %s960_s20, 128, %s962_s1, [#allocation4]  }
 0x527   :  { %1187 = dma.done.wait [#allocation4], 128  }
 0x528   :  { %1188 = vsyncadd [#allocation4], 4294967168 }
 0x529   :  { %969 = vsyncpa [#allocation3], 1 }
 0x52a   :  { %970 = vsyncpa [#allocation6], 1 }
 0x52b   :  { %971 = vsyncpa [#allocation9], 1 }
 0x52c   :  { %972 = vsyncpa [#allocation4], 1 }

</bundles_post_ra>
